<compile_context>
chip_gen: v5e
topology: v5e:2x2
jax: 0.10.0
libtpu: 0.0.40
codegen_flags: <defaults>
</compile_context>

<pallas_src>
import functools

import jax
import jax.numpy as jnp
from jax.experimental import pallas as pl
from jax.experimental.pallas import tpu as pltpu


def hbnode_kernel(gact_ref, spc_ref, x_ref, w_ref, b_ref, out_ref):
    """One (TM, 2H) batch tile.

    gact_ref : (1,) f32 SMEM   precomputed sigmoid(gamma)
    spc_ref  : (1,) f32 SMEM   precomputed softplus(corr)
    x_ref    : (TM, 2H) VMEM   concatenated [h | m]
    w_ref    : (H, H)   VMEM   df linear weight (VMEM-resident across tiles)
    b_ref    : (1, H)   VMEM   df linear bias   (VMEM-resident across tiles)
    out_ref  : (TM, 2H) VMEM   concatenated [dh | dm]
    """
    H = w_ref.shape[0]

    h = x_ref[:, :H]          # (TM, H)  lane-aligned slice
    m = x_ref[:, H:]          # (TM, H)

    # dh = actv_h(-m), actv_h = Identity
    dh = -m

    # df(t, h): MXU matmul + bias + tanh (f32 accumulation)
    dfh = jnp.tanh(
        jnp.dot(h, w_ref[...], preferred_element_type=jnp.float32) + b_ref[...]
    )

    # Grid-invariant scalars, precomputed in the wrapper; SMEM scalar reads
    # broadcast over the tile by the VPU.
    gact = gact_ref[0]        # sigmoid(gamma)
    spc = spc_ref[0]          # softplus(corr)

    dm = dfh - gact * m.astype(jnp.float32) + spc * h.astype(jnp.float32)

    out_ref[:, :H] = dh.astype(out_ref.dtype)
    out_ref[:, H:] = dm.astype(out_ref.dtype)


@functools.partial(jax.jit, static_argnames=("tm",))
def hbnode_forward(t, x, W, b, gamma, corr, *, tm=512):
    """Wrapper. `t` is accepted for API fidelity but the synthetic df ignores it."""
    del t
    B, twoH = x.shape
    H = twoH // 2
    assert twoH == 2 * H, "feature dim must be even (x = [h | m])"
    assert W.shape == (H, H) and b.shape == (1, H)
    # Lane-dense h/m slices and unmasked dh/dm stores need H % 128 == 0.
    assert H % 128 == 0, "H must be a multiple of 128 (pad features in caller)"

    # Sublane packing: bf16 packs 16 rows per vreg, f32 packs 8.
    sub = 16 if x.dtype == jnp.bfloat16 else 8
    assert tm % sub == 0, "batch tile must be a multiple of the sublane packing"

    # Cap the tile at the (sublane-rounded) batch; no wrapper-side padding —
    # Pallas masks the partial last block on writeback.
    tm_eff = max(sub, min(tm, pl.cdiv(B, sub) * sub))
    grid = (pl.cdiv(B, tm_eff),)

    # Hoist the grid-invariant transcendentals out of the kernel.
    gact = jax.nn.sigmoid(gamma.astype(jnp.float32))   # (1,)
    spc = jax.nn.softplus(corr.astype(jnp.float32))    # (1,)

    # Scoped-VMEM budget: x/out double-buffered tiles + resident W/b
    # (default double-buffered) + headroom. Cap at 64 MiB (v7x physical).
    x_item = jnp.dtype(x.dtype).itemsize
    w_item = jnp.dtype(W.dtype).itemsize
    vmem_needed = (
        2 * 2 * tm_eff * twoH * x_item      # x and out, double-buffered
        + 2 * (H * H + H) * w_item          # W and b
    )
    vmem_limit = min(max(int(vmem_needed * 1.5) + (2 << 20), 32 << 20), 64 << 20)

    out = pl.pallas_call(
        hbnode_kernel,
        out_shape=jax.ShapeDtypeStruct((B, twoH), x.dtype),
        grid=grid,
        in_specs=[
            pl.BlockSpec(memory_space=pltpu.MemorySpace.SMEM),   # sigmoid(gamma)
            pl.BlockSpec(memory_space=pltpu.MemorySpace.SMEM),   # softplus(corr)
            pl.BlockSpec((tm_eff, twoH), lambda i: (i, 0)),      # x batch tile (pipelined)
            pl.BlockSpec((H, H), lambda i: (0, 0)),              # W resident across tiles
            pl.BlockSpec((1, H), lambda i: (0, 0)),              # b resident across tiles
        ],
        out_specs=pl.BlockSpec((tm_eff, twoH), lambda i: (i, 0)),
        compiler_params=pltpu.CompilerParams(
            dimension_semantics=("parallel",),   # v7x: shard batch tiles over 2 TCs
            vmem_limit_bytes=vmem_limit,
        ),
    )(gact, spc, x, W, b)
    return out


def hbnode_reference(t, x, W, b, gamma, corr):
    del t
    H = W.shape[0]
    h, m = x[:, :H], x[:, H:]
    dh = -m
    dm = jnp.tanh(h @ W + b) - jax.nn.sigmoid(gamma[0]) * m + jax.nn.softplus(corr[0]) * h
    return jnp.concatenate([dh, dm], axis=1)


if __name__ == "__main__":
    # x has 2*H = 256 features (H=128 is the minimum lane-aligned hidden size).
    # B = 1000 with the default TM=512 gives grid=(2,) with a partial last
    # block (488 valid rows), exercising the no-pad masked-tail path.
    B, H = 1000, 128

    key = jax.random.PRNGKey(0)
    kx, kw, kb = jax.random.split(key, 3)

    x = jax.random.normal(kx, (B, 2 * H), dtype=jnp.float32)
    # Deterministic df parameters (Linear(H, H)), ~PyTorch default init scale.
    W = jax.random.uniform(kw, (H, H), jnp.float32, -1.0, 1.0) / jnp.sqrt(H)
    b = jax.random.uniform(kb, (1, H), jnp.float32, -1.0, 1.0) / jnp.sqrt(H)

    # HBNODE learned scalars at their __init__ defaults.
    gamma = jnp.full((1,), -3.0, dtype=jnp.float32)   # gamma_guess
    corr = jnp.full((1,), -100.0, dtype=jnp.float32)  # corr

    t = jnp.float32(0.0)

    out = hbnode_forward(t, x, W, b, gamma, corr)
    out = jax.block_until_ready(out)

    ref = hbnode_reference(t, x, W, b, gamma, corr)
    assert out.shape == (B, 2 * H)
    assert out.dtype == x.dtype
    assert jnp.allclose(out, ref, atol=1e-5, rtol=1e-5)

    print("KERNEL_OK")
</pallas_src>

<mosaic_0001>
module attributes {stable_mosaic.version = 11 : i64} {
  func.func @hbnode_kernel(%arg0: i32, %arg1: memref<1xf32, #tpu.memory_space<smem>>, %arg2: memref<1xf32, #tpu.memory_space<smem>>, %arg3: memref<512x256xf32, #tpu.memory_space<vmem>>, %arg4: memref<128x128xf32, #tpu.memory_space<vmem>>, %arg5: memref<1x128xf32, #tpu.memory_space<vmem>>, %arg6: memref<512x256xf32, #tpu.memory_space<vmem>>) attributes {dimension_semantics = [#tpu.dimension_semantics<parallel>], iteration_bounds = array<i64: 2>, scalar_prefetch = 0 : i64, scratch_operands = 0 : i64, tpu.core_type = #tpu.core_type<tc>, window_params = [{transform_indices = @transform_0, window_bounds = array<i64: 1>}, {transform_indices = @transform_1, window_bounds = array<i64: 1>}, {transform_indices = @transform_2, window_bounds = array<i64: 512, 256>}, {pipeline_mode = #tpu.pipeline_mode<synchronous>, transform_indices = @transform_3, window_bounds = array<i64: 128, 128>}, {pipeline_mode = #tpu.pipeline_mode<synchronous>, transform_indices = @transform_4, window_bounds = array<i64: 1, 128>}, {transform_indices = @transform_5, window_bounds = array<i64: 512, 256>}]} {
    %c0 = arith.constant 0 : index
    %c0_0 = arith.constant 0 : index
    %0 = vector.load %arg3[%c0, %c0_0] : memref<512x256xf32, #tpu.memory_space<vmem>>, vector<512x128xf32>
    %c0_1 = arith.constant 0 : index
    %c128 = arith.constant 128 : index
    %1 = vector.load %arg3[%c0_1, %c128] : memref<512x256xf32, #tpu.memory_space<vmem>>, vector<512x128xf32>
    %cst = arith.constant 0.000000e+00 : f32
    %2 = vector.broadcast %cst : f32 to vector<512x128xf32>
    %3 = arith.subf %2, %1 : vector<512x128xf32>
    %c0_2 = arith.constant 0 : index
    %c0_3 = arith.constant 0 : index
    %4 = vector.load %arg4[%c0_2, %c0_3] : memref<128x128xf32, #tpu.memory_space<vmem>>, vector<128x128xf32>
    %cst_4 = arith.constant dense<0.000000e+00> : vector<512x128xf32>
    %5 = tpu.matmul %0, %4, %cst_4 {dimension_numbers = #tpu.dot_dimension_numbers<[1], [0], [0], [1], [0, 0, 1, 1], [], []>} : vector<512x128xf32>, vector<128x128xf32>, vector<512x128xf32> -> vector<512x128xf32>
    %c0_5 = arith.constant 0 : index
    %c0_6 = arith.constant 0 : index
    %6 = vector.load %arg5[%c0_5, %c0_6] : memref<1x128xf32, #tpu.memory_space<vmem>>, vector<1x128xf32>
    %7 = vector.broadcast %6 : vector<1x128xf32> to vector<512x128xf32>
    %8 = arith.addf %5, %7 : vector<512x128xf32>
    %9 = math.tanh %8 : vector<512x128xf32>
    %c0_7 = arith.constant 0 : index
    %10 = memref.load %arg1[%c0_7] : memref<1xf32, #tpu.memory_space<smem>>
    %c0_8 = arith.constant 0 : index
    %11 = memref.load %arg2[%c0_8] : memref<1xf32, #tpu.memory_space<smem>>
    %12 = vector.broadcast %10 : f32 to vector<512x128xf32>
    %13 = arith.mulf %12, %1 : vector<512x128xf32>
    %14 = arith.subf %9, %13 : vector<512x128xf32>
    %15 = vector.broadcast %11 : f32 to vector<512x128xf32>
    %16 = arith.mulf %15, %0 : vector<512x128xf32>
    %17 = arith.addf %14, %16 : vector<512x128xf32>
    %c0_9 = arith.constant 0 : index
    %c0_10 = arith.constant 0 : index
    %18 = vector.load %arg6[%c0_9, %c0_10] : memref<512x256xf32, #tpu.memory_space<vmem>>, vector<512x128xf32>
    tpu.vector_store %arg6[%c0_9, %c0_10], %3 {strides = array<i32>} : memref<512x256xf32, #tpu.memory_space<vmem>>, vector<512x128xf32>,
    %c0_11 = arith.constant 0 : index
    %c128_12 = arith.constant 128 : index
    %19 = vector.load %arg6[%c0_11, %c128_12] : memref<512x256xf32, #tpu.memory_space<vmem>>, vector<512x128xf32>
    tpu.vector_store %arg6[%c0_11, %c128_12], %17 {strides = array<i32>} : memref<512x256xf32, #tpu.memory_space<vmem>>, vector<512x128xf32>,
    return
  }
  func.func @transform_0(%arg0: i32) -> i32 {
    %c0_i32 = arith.constant 0 : i32
    %c0_i32_0 = arith.constant 0 : i32
    return %c0_i32 : i32
  }
  func.func @transform_1(%arg0: i32) -> i32 {
    %c0_i32 = arith.constant 0 : i32
    %c0_i32_0 = arith.constant 0 : i32
    return %c0_i32 : i32
  }
  func.func @transform_2(%arg0: i32) -> (i32, i32) {
    %c0_i32 = arith.constant 0 : i32
    %c0_i32_0 = arith.constant 0 : i32
    return %arg0, %c0_i32 : i32, i32
  }
  func.func @transform_3(%arg0: i32) -> (i32, i32) {
    %c0_i32 = arith.constant 0 : i32
    %c0_i32_0 = arith.constant 0 : i32
    %c0_i32_1 = arith.constant 0 : i32
    return %c0_i32, %c0_i32_0 : i32, i32
  }
  func.func @transform_4(%arg0: i32) -> (i32, i32) {
    %c0_i32 = arith.constant 0 : i32
    %c0_i32_0 = arith.constant 0 : i32
    %c0_i32_1 = arith.constant 0 : i32
    return %c0_i32, %c0_i32_0 : i32, i32
  }
  func.func @transform_5(%arg0: i32) -> (i32, i32) {
    %c0_i32 = arith.constant 0 : i32
    %c0_i32_0 = arith.constant 0 : i32
    return %arg0, %c0_i32 : i32, i32
  }
}

</mosaic_0001>

<bundles_post_ra>
// kernel: hbnode_forward.1
= control target key start
LH: loop header
LB: loop body
LE: loop exit
PB: predicated region body
PF: predicated region fallthrough
CT: control target
= control target key end

     0   :  { %s2852_s0 = inlined_call_operand.<no memory space> [shape: f32[1], index: 0, kind: input, shape index: {}]   ;;  %s2853_s1 = inlined_call_operand.<no memory space> [shape: f32[1], index: 1, kind: input, shape index: {}]   ;;  %s2854_s2 = inlined_call_operand.hbm [shape: f32[1000,256], index: 2, kind: input, shape index: {}]   ;;  %s2855_s3 = inlined_call_operand.hbm [shape: f32[128,128], index: 3, kind: input, shape index: {}]   ;;  %s2856_s4 = inlined_call_operand.vmem [shape: f32[1,128], index: 4, kind: input, shape index: {}]   ;;  %s2857_s5 = inlined_call_operand.hbm [shape: f32[1000,256], index: 5, kind: output, shape index: {}]  }
   0x1   :  { %10 = sst [smem:[#allocation2]] %s2852_s0 }
   0x2   :  { %11 = sst [smem:[#allocation3]] %s2853_s1 }
   0x3   :  { %12 = vsyncpa [#allocation5], 0 }
   0x4   :  { %14 = vsyncpa [#allocation5 + $0x1], 0 }
   0x5   :  { %15 = vsyncpa [#allocation8], 0 }
   0x6   :  { %16 = vsyncpa [#allocation6], 0 }
   0x7   :  { %18 = vsyncpa [#allocation6 + $0x1], 0  ;;  %s1761_s22 = smov 0   ;;  %s1763_s23 = smov 0  }
   0x8   :  { %s1765_s24 = smov 0   ;;  %s1767_s25 = smov 0  }
   0x9 LB: > { %s1782_s0 = sadd.s32 4294967295, %s1714_s25   ;;  %s1266_s1 = sadd.s32 4294967294, %s1714_s25   ;;  %s1714_s25 = sphi %s1767_s25, %s2883_s25   ;;  %s1710_s24 = sphi %s1765_s24, %s2882_s24   ;;  %s1706_s23 = sphi %s1763_s23, %s2881_s23   ;;  %s1702_s22 = sphi %s1761_s22, %s2880_s22  }
   0xa   : > { %s1786_s26 = sadd.s32 1, %s1714_s25   ;;  %s73_s27 = sadd.s32 1, %s1710_s24 }
   0xb   : > { %s70_s28 = ssub.s32 %s1714_s25, %s1786_s26  ;;  %p80_p0 = scmp.ne.s32.totalorder %s1710_s24, %s1706_s23 }
   0xc   : > { %p71_p1 = scmp.eq.s32.totalorder %s70_s28, 0  ;;  %p81_p2 = scmp.eq.s32.totalorder %s1714_s25, 0 }
   0xd   : > { %p86_p3 = scmp.ne.s32.totalorder %s1706_s23, %s1702_s22  ;;  %p2859_p4 = scmp.eq.s32.totalorder %s1782_s0, 0 }
   0xe   : > { %s1798_s29 = scalar_select %p71_p1, %s1710_s24, %s73_s27  }
   0xf   : > { %p1800_p5 = por %p81_p2, %p80_p0  ;;  %p1806_p6 = por %p2859_p4, %p86_p3 }
  0x10   : > { %p152_p7 = scmp.eq.s32.totalorder %s1782_s0, 1  ;;  %p158_p8 = scmp.eq.s32.totalorder %s1266_s1, 1 }
  0x11   : > { %p1267_p9 = scmp.ge.s32.totalorder %s1714_s25, 1  ;;  %p165_p10 = scmp.lt.s32.totalorder %s1714_s25, 3 }
  0x12   : > { %p1813_p11 = por %p152_p7, %p80_p0  ;;  %p1817_p12 = por %p158_p8, %p86_p3 }
  0x13   : > { %p1821_p13 = pnand %p1267_p9, %p165_p10  ;;  %s182_s12 = sshll.u32 %s2855_s3, 4  ;;  %s183_s12 = int_to_ptr.hbm [resolvable:$true] %s182_s12 }
  0x14   : > { %s2866_s8 = scalar_select %p1817_p12, 1, 0 }
  0x15   : > { %p1354_p1 = pneg %p1821_p13  ;;  %s1716_s13 = smov [#allocation7]  }
  0x16   : > { %s184_s14 = sshll.u32 %s1716_s13, 4  ;;  %s1717_s15 = smov 128   ;;  %s185_s14 = int_to_ptr.vmem [resolvable:$true] %s184_s14 }
  0x17   : > { %p1355_p0 = pnand %p1354_p1, %p2859_p4  ;;  %s1718_s16 = smov 8  }
  0x18   : > { %p2858_p2 = scmp.ge.s32.totalorder %s1714_s25, 2 }
  0x19   : > { %1357 = dma.hbm_to_vmem [thread:$0]  (!%p1355_p0), %s183_s12, 2048, %s185_s14, [#allocation8], %s1717_s15, %s1717_s15, %s1718_s16  }
  0x1a   : > { %197 = sbr.rel (%p2858_p2) target bundleno = 67 (0x43), region = 32 }
  0x1f   : > { %200 = sbr.rel (!%p1800_p5) target bundleno = 67 (0x43), region = 36  ;;  %s201_s17 = sand.u32 (%p1800_p5), 1, %s1710_s24  }
  0x20   : > { %s1271_s18 = sshll.u32 (%p1800_p5), %s1714_s25, 6  ;;  %s1270_s19 = sshll.u32 (%p1800_p5), %s201_s17, 10 }
  0x21   : > { %s207_s20 = ssub.s32 (%p1800_p5), 125, %s1271_s18  ;;  %s1842_s28 = scalar_lea.sflag (%p1800_p5), [#allocation5], %s201_s17 }
  0x22   : > { %p208_p3 = scmp.lt.s32.totalorder (%p1800_p5), %s207_s20, 64  ;;  %s205_s10 = scalar_lea.vmem (%p1800_p5), [#allocation4], %s1270_s19 }
  0x24   : > { %s2885_s20 = smov (!%p208_p3, %s207_s20), 64 }
  0x25   : > { %s1294_s21 = sshll.u32 %s2885_s20, 4 }
  0x26   : > { %s212_s1 = ssub.s32 1024, %s1294_s21 }
  0x27   : > { %s213_s27 = sshll.u32 %s212_s1, 4 }
  0x28   : > { %214 = vsyncadd %s1842_s28, %s213_s27  ;;  %p1845_p5 = scmp.ne.s32.totalorder %s1294_s21, 0  ;;  %s1296_s11 = sshll.u32 %s1714_s25, 10 }
  0x29   : > { %s218_s14 = scalar_lea.hbm %s2854_s2, %s1296_s11  ;;  %s1853_s15 = sshll.u32 %s205_s10, 4  ;;  %s223_s15 = int_to_ptr.vmem [resolvable:$true] %s1853_s15 }
  0x2a   : > { %s220_s16 = sshll.u32 %s218_s14, 4  ;;  %s1278_s17 = sshll.u32 %s2885_s20, 8  ;;  %s1856_s16 = int_to_ptr.hbm [resolvable:$true] %s220_s16 }
  0x2b   : > { %s1594_s18 = sshra.s32 %s1856_s16, 4  ;;  %s1596_s19 = sshrl.u32 %s1278_s17, 4  ;;  %s1595_s18 = int_to_ptr.hbm [resolvable:$true] %s1594_s18 }
  0x2c   : > { %s1601_s21 = scalar_lea.hbm %s1595_s18, %s1596_s19  ;;  %s1605_s10 = scalar_lea.hbm %s2854_s2, 2000 }
  0x2d   : > { %p1602_p7 = scmp.ne.s32.totalorder %s1595_s18, %s1601_s21  ;;  %p1606_p10 = scmp.lt.s32.totalorder %s1595_s18, %s2854_s2 }
  0x2e   : > { %p1607_p1 = scmp.lt.s32.totalorder %s1605_s10, %s1601_s21 }
  0x2f   : > { %p1603_p8 = pnand %p1602_p7, %p1845_p5 }
  0x30   : > { %p1608_p0 = por %p1607_p1, %p1606_p10 }
  0x31   : > { %p1604_p9 = pneg %p1603_p8 }
  0x33   : > { %p1609_p3 = pnand %p1608_p0, %p1604_p9 }
  0x35   : > { %1612 = shalt.err (!%p1609_p3)
}
  0x36   : > { %s1613_s13 = sshra.s32 %s223_s15, 4  ;;  %s1719_s1 = smov [#allocation4]   ;;  %s1614_s13 = int_to_ptr.vmem [resolvable:$true] %s1613_s13 }
  0x37   : > { %s1620_s14 = scalar_lea.vmem %s1614_s13, %s1596_s19  ;;  %s1624_s27 = scalar_lea.vmem %s1719_s1, 2048 }
  0x38   : > { %p1621_p7 = scmp.ne.s32.totalorder %s1614_s13, %s1620_s14  ;;  %p1626_p4 = scmp.lt.s32.totalorder %s1624_s27, %s1620_s14 }
  0x3a   : > { %p1622_p8 = pnand %p1621_p7, %p1845_p5 }
  0x3c   : > { %p1623_p2 = pneg %p1622_p8 }
  0x3e   : > { %p1628_p12 = pnand %p1626_p4, %p1623_p2 }
  0x40   : > { %1631 = shalt.err (!%p1628_p12)
}
  0x41   : > { %s1720_s18 = smov 256   ;;  %s1721_s21 = smov 16  }
  0x42   : > { %228 = dma.hbm_to_vmem [thread:$0]  (%p1845_p5), %s1856_s16, %s1278_s17, %s223_s15, %s1842_s28, %s1720_s18, %s1720_s18, %s1721_s21  }
  0x43 PF: > { %234 = sbr.rel (%p1821_p13) target bundleno = 409 (0x199), region = 40 }
  0x48   : > { %s1885_s19 = sand.u32 1, %s1706_s23  }
  0x49   : > { %s1280_s10 = sshll.u32 %s1885_s19, 10  ;;  %s237_s11 = scalar_lea.sflag [#allocation5], %s1885_s19 }
  0x4a   : > { %s1891_s12 = scalar_lea.vmem [#allocation4], %s1280_s10 }
  0x4b   : > { %1689 = dma.done.wait (%p1806_p6), %s237_s11, 16384  }
  0x4c   : > { %1691 = vsyncadd (%p1806_p6), %s237_s11, 4294950912  ;;  %p2869_p4 = scmp.eq.s32.totalorder %s1782_s0, 0 }
  0x4e   : > { %1693 = dma.done.wait (%p2869_p4), [#allocation8], 2048   ;;  %p2870_p12 = pmov %p2869_p4 }
  0x4f   : > { %v492_v0 = vld [vmem:[#allocation7 + $0x78] sm:$0xff]  ;;  %v491_v1 = vld [vmem:[#allocation7 + $0x70] sm:$0xff]  ;;  %v490_v2 = vld [vmem:[#allocation7 + $0x68] sm:$0xff]  ;;  %s2059_s6 = scalar_lea.vmem [#allocation9], %s1280_s10  ;;  %s770_s9 = sld [smem:[#allocation2]] }
  0x50   : > { %1695 = vsyncadd (%p2870_p12), [#allocation8], 4294965248  ;;  %1301 = vmatpush.msra.mxu2 %v492_v0  ;;  %1302 = vmatpush.msra.mxu3 %v492_v0  ;;  %v489_v3 = vld [vmem:[#allocation7 + $0x60] sm:$0xff]  ;;  %v488_v4 = vld [vmem:[#allocation7 + $0x58] sm:$0xff]  ;;  %s771_s20 = sld [smem:[#allocation3]]  ;;  %s1159_s17 = scalar_lea.sflag [#allocation6], %s1885_s19 }
  0x51   : > { %497 = vmatpush.msra.mxu0 %v492_v0  ;;  %1300 = vmatpush.msra.mxu1 %v492_v0  ;;  %v487_v5 = vld [vmem:[#allocation7 + $0x50] sm:$0xff]  ;;  %v486_v6 = vld [vmem:[#allocation7 + $0x48] sm:$0xff]  ;;  %v485_v7 = vld [vmem:[#allocation7 + $0x40] sm:$0xff]  ;;  %s1284_s13 = sshll.u32 (%p1813_p11), %s1782_s0, 6 }
  0x52   : > { %1304 = vmatpush.msra.mxu2 %v491_v1  ;;  %1305 = vmatpush.msra.mxu3 %v491_v1  ;;  %v484_v8 = vld [vmem:[#allocation7 + $0x38] sm:$0xff]  ;;  %v483_v9 = vld [vmem:[#allocation7 + $0x30] sm:$0xff]  ;;  %v482_v10 = vld [vmem:[#allocation7 + $0x28] sm:$0xff]  ;;  %s1167_s14 = ssub.s32 (%p1813_p11), 125, %s1284_s13 }
  0x53   : > { %498 = vmatpush.msra.mxu0 %v491_v1  ;;  %1303 = vmatpush.msra.mxu1 %v491_v1  ;;  %v481_v11 = vld [vmem:[#allocation7 + $0x20] sm:$0xff]  ;;  %v480_v12 = vld [vmem:[#allocation7 + $0x18] sm:$0xff]  ;;  %v479_v13 = vld [vmem:[#allocation7 + $0x10] sm:$0xff]  ;;  %p1168_p6 = scmp.lt.s32.totalorder (%p1813_p11), %s1167_s14, 64 }
  0x54   : > { %1307 = vmatpush.msra.mxu2 %v490_v2  ;;  %1308 = vmatpush.msra.mxu3 %v490_v2  ;;  %v478_v14 = vld [vmem:[#allocation7 + $0x8] sm:$0xff]  ;;  %v477_v15 = vld [vmem:[#allocation7] sm:$0xff]  ;;  %v1918_v20 = vld [vmem:[%s1891_s12 + $0x210] sm:$0xff] }
  0x55   : > { %499 = vmatpush.msra.mxu0 %v490_v2  ;;  %1306 = vmatpush.msra.mxu1 %v490_v2  ;;  %v1902_v16 = vld [vmem:[%s1891_s12 + $0x200] sm:$0xff]  ;;  %v1921_v21 = vld [vmem:[%s1891_s12 + $0x310] sm:$0xff]  ;;  %v2052_v0 = vld [vmem:[%s1891_s12 + $0x8] sm:$0xff] }
  0x56   : > { %1310 = vmatpush.msra.mxu2 %v489_v3  ;;  %1311 = vmatpush.msra.mxu3 %v489_v3  ;;  %v1905_v17 = vld [vmem:[%s1891_s12 + $0x300] sm:$0xff]  ;;  %v1924_v22 = vld [vmem:[%s1891_s12 + $0x10] sm:$0xff]  ;;  %v413_v1 = vsub.f32 0.0, %v2052_v0 }
  0x57   : > { %500 = vmatpush.msra.mxu0 %v489_v3  ;;  %1309 = vmatpush.msra.mxu1 %v489_v3  ;;  %v1908_v18 = vld [vmem:[%s1891_s12] sm:$0xff]  ;;  %v1927_v23 = vld [vmem:[%s1891_s12 + $0x110] sm:$0xff] }
  0x58   : > { %1313 = vmatpush.msra.mxu2 %v488_v4  ;;  %1314 = vmatpush.msra.mxu3 %v488_v4  ;;  %v1911_v19 = vld [vmem:[%s1891_s12 + $0x100] sm:$0xff]  ;;  %v1950_v28 = vld [vmem:[%s1891_s12 + $0x230] sm:$0xff]  ;;  %1030 = vst [vmem:[%s2059_s6] sm:$0xff] %v413_v1  ;;  %v2107_v1 = vld [vmem:[%s1891_s12 + $0x318] sm:$0xff] }
  0x59   : > { %501 = vmatpush.msra.mxu0 %v488_v4  ;;  %1312 = vmatpush.msra.mxu1 %v488_v4  ;;  %v1934_v24 = vld [vmem:[%s1891_s12 + $0x220] sm:$0xff]  ;;  %v1953_v29 = vld [vmem:[%s1891_s12 + $0x330] sm:$0xff] }
  0x5a   : > { %1316 = vmatpush.msra.mxu2 %v487_v5  ;;  %1317 = vmatpush.msra.mxu3 %v487_v5  ;;  %v1937_v25 = vld [vmem:[%s1891_s12 + $0x320] sm:$0xff]  ;;  %v1956_v30 = vld [vmem:[%s1891_s12 + $0x30] sm:$0xff] }
  0x5b   : > { %502 = vmatpush.msra.mxu0 %v487_v5  ;;  %1315 = vmatpush.msra.mxu1 %v487_v5  ;;  %v1940_v26 = vld [vmem:[%s1891_s12 + $0x20] sm:$0xff]  ;;  %v1959_v31 = vld [vmem:[%s1891_s12 + $0x130] sm:$0xff] }
  0x5c   : > { %1319 = vmatpush.msra.mxu2 %v486_v6  ;;  %1320 = vmatpush.msra.mxu3 %v486_v6  ;;  %v1943_v27 = vld [vmem:[%s1891_s12 + $0x120] sm:$0xff]  ;;  %v1982_v36 = vld [vmem:[%s1891_s12 + $0x250] sm:$0xff] }
  0x5d   : > { %503 = vmatpush.msra.mxu0 %v486_v6  ;;  %1318 = vmatpush.msra.mxu1 %v486_v6  ;;  %v1966_v32 = vld [vmem:[%s1891_s12 + $0x240] sm:$0xff]  ;;  %v1985_v37 = vld [vmem:[%s1891_s12 + $0x350] sm:$0xff] }
  0x5e   : > { %1322 = vmatpush.msra.mxu2 %v485_v7  ;;  %1323 = vmatpush.msra.mxu3 %v485_v7  ;;  %v1969_v33 = vld [vmem:[%s1891_s12 + $0x340] sm:$0xff]  ;;  %v1988_v38 = vld [vmem:[%s1891_s12 + $0x50] sm:$0xff] }
  0x5f   : > { %504 = vmatpush.msra.mxu0 %v485_v7  ;;  %1321 = vmatpush.msra.mxu1 %v485_v7  ;;  %v1972_v34 = vld [vmem:[%s1891_s12 + $0x40] sm:$0xff]  ;;  %v1991_v39 = vld [vmem:[%s1891_s12 + $0x150] sm:$0xff] }
  0x60   : > { %1325 = vmatpush.msra.mxu2 %v484_v8  ;;  %1326 = vmatpush.msra.mxu3 %v484_v8  ;;  %v1975_v35 = vld [vmem:[%s1891_s12 + $0x140] sm:$0xff]  ;;  %v2014_v44 = vld [vmem:[%s1891_s12 + $0x270] sm:$0xff] }
  0x61   : > { %505 = vmatpush.msra.mxu0 %v484_v8  ;;  %1324 = vmatpush.msra.mxu1 %v484_v8  ;;  %v1998_v40 = vld [vmem:[%s1891_s12 + $0x260] sm:$0xff]  ;;  %v2017_v45 = vld [vmem:[%s1891_s12 + $0x370] sm:$0xff] }
  0x62   : > { %1328 = vmatpush.msra.mxu2 %v483_v9  ;;  %1329 = vmatpush.msra.mxu3 %v483_v9  ;;  %v2001_v41 = vld [vmem:[%s1891_s12 + $0x360] sm:$0xff]  ;;  %2871 = vst [vmem:[#allocation13_spill] sm:$0xff] %v2017_v45  ;;  %v2020_v46 = vld [vmem:[%s1891_s12 + $0x70] sm:$0xff] }
  0x63   : > { %506 = vmatpush.msra.mxu0 %v483_v9  ;;  %1327 = vmatpush.msra.mxu1 %v483_v9  ;;  %v2004_v42 = vld [vmem:[%s1891_s12 + $0x60] sm:$0xff]  ;;  %v2023_v47 = vld [vmem:[%s1891_s12 + $0x170] sm:$0xff] }
  0x64   : > { %1331 = vmatpush.msra.mxu2 %v482_v10  ;;  %1332 = vmatpush.msra.mxu3 %v482_v10  ;;  %v2007_v43 = vld [vmem:[%s1891_s12 + $0x160] sm:$0xff]  ;;  %v326_v52 = vld [vmem:[%s1891_s12 + $0x290] sm:$0xff] }
  0x65   : > { %507 = vmatpush.msra.mxu0 %v482_v10  ;;  %1330 = vmatpush.msra.mxu1 %v482_v10  ;;  %v325_v48 = vld [vmem:[%s1891_s12 + $0x280] sm:$0xff]  ;;  %v342_v53 = vld [vmem:[%s1891_s12 + $0x390] sm:$0xff]  ;;  %v2069_v10 = vld [vmem:[%s1891_s12 + $0x108] sm:$0xff] }
  0x66   : > { %1334 = vmatpush.msra.mxu2 %v481_v11  ;;  %1335 = vmatpush.msra.mxu3 %v481_v11  ;;  %v341_v49 = vld [vmem:[%s1891_s12 + $0x380] sm:$0xff]  ;;  %v294_v54 = vld [vmem:[%s1891_s12 + $0x90] sm:$0xff] }
  0x67   : > { %508 = vmatpush.msra.mxu0 %v481_v11  ;;  %1333 = vmatpush.msra.mxu1 %v481_v11  ;;  %v2032_v50 = vld [vmem:[%s1891_s12 + $0x80] sm:$0xff]  ;;  %v310_v55 = vld [vmem:[%s1891_s12 + $0x190] sm:$0xff] }
  0x68   : > { %1337 = vmatpush.msra.mxu2 %v480_v12  ;;  %1338 = vmatpush.msra.mxu3 %v480_v12  ;;  %2872 = vst [vmem:[#allocation14_spill] sm:$0xff] %v2032_v50  ;;  %v2035_v51 = vld [vmem:[%s1891_s12 + $0x180] sm:$0xff]  ;;  %v328_v60 = vld [vmem:[%s1891_s12 + $0x2b0] sm:$0xff] }
  0x69   : > { %509 = vmatpush.msra.mxu0 %v480_v12  ;;  %1336 = vmatpush.msra.mxu1 %v480_v12  ;;  %2873 = vst [vmem:[#allocation15_spill] sm:$0xff] %v2035_v51  ;;  %v327_v56 = vld [vmem:[%s1891_s12 + $0x2a0] sm:$0xff]  ;;  %v344_v61 = vld [vmem:[%s1891_s12 + $0x3b0] sm:$0xff] }
  0x6a   : > { %1340 = vmatpush.msra.mxu2 %v479_v13  ;;  %1341 = vmatpush.msra.mxu3 %v479_v13  ;;  %v343_v57 = vld [vmem:[%s1891_s12 + $0x3a0] sm:$0xff]  ;;  %v296_v62 = vld [vmem:[%s1891_s12 + $0xb0] sm:$0xff] }
  0x6b   : > { %510 = vmatpush.msra.mxu0 %v479_v13  ;;  %1339 = vmatpush.msra.mxu1 %v479_v13  ;;  %v295_v58 = vld [vmem:[%s1891_s12 + $0xa0] sm:$0xff]  ;;  %v312_v63 = vld [vmem:[%s1891_s12 + $0x1b0] sm:$0xff]  ;;  %v429_v13 = vsub.f32 0.0, %v2069_v10 }
  0x6c   : > { %1343 = vmatpush.msra.mxu2 %v478_v14  ;;  %1344 = vmatpush.msra.mxu3 %v478_v14  ;;  %v311_v59 = vld [vmem:[%s1891_s12 + $0x1a0] sm:$0xff]  ;;  %v330_v6 = vld [vmem:[%s1891_s12 + $0x2d0] sm:$0xff] }
  0x6d   : > { %511 = vmatpush.msra.mxu0 %v478_v14  ;;  %1342 = vmatpush.msra.mxu1 %v478_v14  ;;  %v329_v2 = vld [vmem:[%s1891_s12 + $0x2c0] sm:$0xff]  ;;  %v346_v7 = vld [vmem:[%s1891_s12 + $0x3d0] sm:$0xff]  ;;  %v2075_v14 = vld [vmem:[%s1891_s12 + $0x208] sm:$0xff]  ;;  %1046 = vst [vmem:[%s2059_s6 + $0x100] sm:$0xff] %v429_v13 }
  0x6e   : > { %1346 = vmatpush.msra.mxu2 %v477_v15  ;;  %1347 = vmatpush.msra.mxu3 %v477_v15  ;;  %v345_v3 = vld [vmem:[%s1891_s12 + $0x3c0] sm:$0xff]  ;;  %v298_v8 = vld [vmem:[%s1891_s12 + $0xd0] sm:$0xff] }
  0x6f   : > { %609 = vmatmul.f32.vlgmr.msra.gmra.mxu2 %v1902_v16  ;;  %657 = vmatmul.f32.vlgmr.msra.gmra.mxu3 %v1905_v17  ;;  %v297_v4 = vld [vmem:[%s1891_s12 + $0xc0] sm:$0xff]  ;;  %v314_v9 = vld [vmem:[%s1891_s12 + $0x1d0] sm:$0xff] }
  0x70   : > { %512 = vmatpush.msra.mxu0 %v477_v15  ;;  %1345 = vmatpush.msra.mxu1 %v477_v15  ;;  %v313_v5 = vld [vmem:[%s1891_s12 + $0x1c0] sm:$0xff]  ;;  %v445_v15 = vsub.f32 0.0, %v2075_v14 }
  0x71   : > { %513 = vmatmul.f32.vlgmr.msra.gmra.mxu0 %v1908_v18  ;;  %561 = vmatmul.f32.vlgmr.msra.gmra.mxu1 %v1911_v19  ;;  %v331_v11 = vld [vmem:[%s1891_s12 + $0x2e0] sm:$0xff] }
  0x72   : > { %v347_v12 = vld [vmem:[%s1891_s12 + $0x3e0] sm:$0xff]  ;;  %1062 = vst [vmem:[%s2059_s6 + $0x200] sm:$0xff] %v445_v15 }
  0x77   : > { %612 = vmatmul.f32.gmra.mxu2 %v1918_v20  ;;  %660 = vmatmul.f32.gmra.mxu3 %v1921_v21 }
  0x79   : > { %516 = vmatmul.f32.gmra.mxu0 %v1924_v22  ;;  %564 = vmatmul.f32.gmra.mxu1 %v1927_v23 }
  0x7f   : > { %615 = vmatmul.f32.gmra.mxu2 %v1934_v24  ;;  %663 = vmatmul.f32.gmra.mxu3 %v1937_v25 }
  0x81   : > { %519 = vmatmul.f32.gmra.mxu0 %v1940_v26  ;;  %567 = vmatmul.f32.gmra.mxu1 %v1943_v27 }
  0x87   : > { %618 = vmatmul.f32.gmra.mxu2 %v1950_v28  ;;  %666 = vmatmul.f32.gmra.mxu3 %v1953_v29 }
  0x89   : > { %522 = vmatmul.f32.gmra.mxu0 %v1956_v30  ;;  %570 = vmatmul.f32.gmra.mxu1 %v1959_v31 }
  0x8f   : > { %621 = vmatmul.f32.gmra.mxu2 %v1966_v32  ;;  %669 = vmatmul.f32.gmra.mxu3 %v1969_v33 }
  0x91   : > { %525 = vmatmul.f32.gmra.mxu0 %v1972_v34  ;;  %573 = vmatmul.f32.gmra.mxu1 %v1975_v35 }
  0x97   : > { %624 = vmatmul.f32.gmra.mxu2 %v1982_v36  ;;  %672 = vmatmul.f32.gmra.mxu3 %v1985_v37 }
  0x99   : > { %528 = vmatmul.f32.gmra.mxu0 %v1988_v38  ;;  %576 = vmatmul.f32.gmra.mxu1 %v1991_v39 }
  0x9f   : > { %627 = vmatmul.f32.gmra.mxu2 %v1998_v40  ;;  %675 = vmatmul.f32.gmra.mxu3 %v2001_v41 }
  0xa1   : > { %531 = vmatmul.f32.gmra.mxu0 %v2004_v42  ;;  %579 = vmatmul.f32.gmra.mxu1 %v2007_v43 }
  0xa7   : > { %630 = vmatmul.f32.gmra.mxu2 %v2014_v44  ;;  %678 = vmatmul.f32.gmra.mxu3 %v2017_v45  ;;  %v2189_v45 = vld [vmem:[%s1891_s12 + $0x148] sm:$0xff] }
  0xa9   : > { %534 = vmatmul.f32.gmra.mxu0 %v2020_v46  ;;  %582 = vmatmul.f32.gmra.mxu1 %v2023_v47 }
  0xaf   : > { %633 = vmatmul.f32.gmra.mxu2 %v325_v48  ;;  %681 = vmatmul.f32.gmra.mxu3 %v341_v49  ;;  %v299_v48 = vld [vmem:[%s1891_s12 + $0xe0] sm:$0xff] }
  0xb0   : > { %v315_v49 = vld [vmem:[%s1891_s12 + $0x1e0] sm:$0xff] }
  0xb1   : > { %537 = vmatmul.f32.gmra.mxu0 %v2032_v50  ;;  %585 = vmatmul.f32.gmra.mxu1 %v2035_v51 }
  0xb7   : > { %636 = vmatmul.f32.gmra.mxu2 %v326_v52  ;;  %684 = vmatmul.f32.gmra.mxu3 %v342_v53  ;;  %v2083_v52 = vld [vmem:[%s1891_s12 + $0x308] sm:$0xff] }
  0xb8   : > { %v461_v53 = vsub.f32 0.0, %v2083_v52 }
  0xb9   : > { %540 = vmatmul.f32.gmra.mxu0 %v294_v54  ;;  %588 = vmatmul.f32.gmra.mxu1 %v310_v55  ;;  %v2087_v54 = vld [vmem:[%s1891_s12 + $0x18] sm:$0xff] }
  0xba   : > { %1078 = vst [vmem:[%s2059_s6 + $0x300] sm:$0xff] %v461_v53  ;;  %v414_v55 = vsub.f32 0.0, %v2087_v54  ;;  %v2137_v53 = vstv %s770_s9 }
  0xbc   : > { %1031 = vst [vmem:[%s2059_s6 + $0x10] sm:$0xff] %v414_v55  ;;  %v2140_v55 = vld [vmem:[%s1891_s12 + $0x38] sm:$0xff] }
  0xbf   : > { %639 = vmatmul.f32.gmra.mxu2 %v327_v56  ;;  %687 = vmatmul.f32.gmra.mxu3 %v343_v57  ;;  %v2092_v56 = vld [vmem:[%s1891_s12 + $0x118] sm:$0xff]  ;;  %v332_v57 = vld [vmem:[%s1891_s12 + $0x2f0] sm:$0xff] }
  0xc1   : > { %543 = vmatmul.f32.gmra.mxu0 %v295_v58  ;;  %591 = vmatmul.f32.gmra.mxu1 %v311_v59  ;;  %v348_v58 = vld [vmem:[%s1891_s12 + $0x3f0] sm:$0xff]  ;;  %v430_v59 = vsub.f32 0.0, %v2092_v56 }
  0xc3   : > { %1047 = vst [vmem:[%s2059_s6 + $0x110] sm:$0xff] %v430_v59  ;;  %v416_v59 = vsub.f32 0.0, %v2140_v55 }
  0xc5   : > { %1033 = vst [vmem:[%s2059_s6 + $0x30] sm:$0xff] %v416_v59 }
  0xc7   : > { %642 = vmatmul.f32.gmra.mxu2 %v328_v60  ;;  %690 = vmatmul.f32.gmra.mxu3 %v344_v61  ;;  %v2099_v60 = vld [vmem:[%s1891_s12 + $0x218] sm:$0xff] }
  0xc8   : > { %v446_v61 = vsub.f32 0.0, %v2099_v60 }
  0xc9   : > { %546 = vmatmul.f32.gmra.mxu0 %v296_v62  ;;  %594 = vmatmul.f32.gmra.mxu1 %v312_v63  ;;  %v300_v62 = vld [vmem:[%s1891_s12 + $0xf0] sm:$0xff] }
  0xca   : > { %v316_v63 = vld [vmem:[%s1891_s12 + $0x1f0] sm:$0xff]  ;;  %1063 = vst [vmem:[%s2059_s6 + $0x210] sm:$0xff] %v446_v61  ;;  %v2144_v61 = vstv %s771_s20 }
  0xcf   : > { %645 = vmatmul.f32.gmra.mxu2 %v329_v2  ;;  %693 = vmatmul.f32.gmra.mxu3 %v345_v3  ;;  %v462_v2 = vsub.f32 0.0, %v2107_v1  ;;  %v2111_v3 = vld [vmem:[%s1891_s12 + $0x28] sm:$0xff] }
  0xd1   : > { %549 = vmatmul.f32.gmra.mxu0 %v297_v4  ;;  %597 = vmatmul.f32.gmra.mxu1 %v313_v5  ;;  %1079 = vst [vmem:[%s2059_s6 + $0x310] sm:$0xff] %v462_v2  ;;  %v415_v4 = vsub.f32 0.0, %v2111_v3  ;;  %v2118_v5 = vld [vmem:[%s2856_s4] ss:$0 sm:$0xff]  ;;  %v2149_v2 = vld [vmem:[%s1891_s12 + $0x138] sm:$0xff] }
  0xd3   : > { %1032 = vst [vmem:[%s2059_s6 + $0x20] sm:$0xff] %v415_v4  ;;  %v773_v4 = vmul.f32 %v2137_v53, %v2052_v0 }
  0xd7   : > { %648 = vmatmul.f32.gmra.mxu2 %v330_v6  ;;  %696 = vmatmul.f32.gmra.mxu3 %v346_v7  ;;  %v2121_v6 = vld [vmem:[%s1891_s12 + $0x128] sm:$0xff] }
  0xd8   : > { %v431_v7 = vsub.f32 0.0, %v2121_v6 }
  0xd9   : > { %552 = vmatmul.f32.gmra.mxu0 %v298_v8  ;;  %600 = vmatmul.f32.gmra.mxu1 %v314_v9  ;;  %v2126_v8 = vld [vmem:[%s1891_s12 + $0x228] sm:$0xff] }
  0xda   : > { %v447_v9 = vsub.f32 0.0, %v2126_v8  ;;  %1048 = vst [vmem:[%s2059_s6 + $0x120] sm:$0xff] %v431_v7  ;;  %v432_v7 = vsub.f32 0.0, %v2149_v2 }
  0xdc   : > { %1064 = vst [vmem:[%s2059_s6 + $0x220] sm:$0xff] %v447_v9  ;;  %v2156_v9 = vld [vmem:[%s1891_s12 + $0x238] sm:$0xff] }
  0xdd   : > { %1049 = vst [vmem:[%s2059_s6 + $0x130] sm:$0xff] %v432_v7 }
  0xdf   : > { %651 = vmatmul.f32.gmra.mxu2 %v331_v11  ;;  %699 = vmatmul.f32.gmra.mxu3 %v347_v12 }
  0xe1   : > { %555 = vmatmul.f32.gmra.mxu0 %v299_v48  ;;  %603 = vmatmul.f32.gmra.mxu1 %v315_v49  ;;  %v2134_v48 = vld [vmem:[%s1891_s12 + $0x328] sm:$0xff] }
  0xe2   : > { %v463_v49 = vsub.f32 0.0, %v2134_v48 }
  0xe4   : > { %1080 = vst [vmem:[%s2059_s6 + $0x320] sm:$0xff] %v463_v49 }
  0xe7   : > { %654 = vmatmul.f32.gmra.mxu2 %v332_v57  ;;  %702 = vmatmul.f32.gmra.mxu3 %v348_v58 }
  0xe9   : > { %558 = vmatmul.f32.gmra.mxu0 %v300_v62  ;;  %606 = vmatmul.f32.gmra.mxu1 %v316_v63 }
  0xee   : > { %v514_v11 = vpop.f32.mrf.mxu0  ;;  %v562_v12 = vpop.f32.mrf.mxu1 }
  0xef   : > { %v515_v13 = vadd.f32 %v2118_v5, %v514_v11  ;;  %v563_v15 = vadd.f32 %v2118_v5, %v562_v12  ;;  %v789_v11 = vmul.f32 %v2137_v53, %v2069_v10  ;;  %v448_v12 = vsub.f32 0.0, %v2156_v9  ;;  %v2170_v10 = vld [vmem:[%s1891_s12 + $0x338] sm:$0xff] }
  0xf1   : > { %1405 = vtanh.f32 %v515_v13  ;;  %v902_v13 = vmul.f32 %v2144_v61, %v1908_v18  ;;  %1065 = vst [vmem:[%s2059_s6 + $0x230] sm:$0xff] %v448_v12  ;;  %v805_v18 = vmul.f32 %v2137_v53, %v2075_v14  ;;  %v934_v12 = vmul.f32 %v2144_v61, %v1902_v16 }
  0xf2   : > { %1407 = vtanh.f32 %v563_v15  ;;  %v610_v57 = vpop.f32.mrf.mxu2  ;;  %v658_v58 = vpop.f32.mrf.mxu3 }
  0xf3   : > { %v611_v62 = vadd.f32 %v2118_v5, %v610_v57  ;;  %v659_v63 = vadd.f32 %v2118_v5, %v658_v58  ;;  %v918_v57 = vmul.f32 %v2144_v61, %v1911_v19  ;;  %v821_v19 = vmul.f32 %v2137_v53, %v2083_v52 }
  0xf4   : > { %v950_v52 = vmul.f32 %v2144_v61, %v1905_v17  ;;  %v790_v17 = vmul.f32 %v2137_v53, %v2092_v56  ;;  %v919_v56 = vmul.f32 %v2144_v61, %v1927_v23  ;;  %v822_v23 = vmul.f32 %v2137_v53, %v2107_v1 }
  0xf5   : > { %1409 = vtanh.f32 %v611_v62  ;;  %v951_v1 = vmul.f32 %v2144_v61, %v1921_v21  ;;  %v791_v21 = vmul.f32 %v2137_v53, %v2121_v6  ;;  %v920_v6 = vmul.f32 %v2144_v61, %v1943_v27 }
  0xf6   : > { %1411 = vtanh.f32 %v659_v63  ;;  %v517_v15 = vpop.f32.mrf.mxu0  ;;  %v565_v0 = vpop.f32.mrf.mxu1  ;;  %v464_v63 = vsub.f32 0.0, %v2170_v10  ;;  %v823_v27 = vmul.f32 %v2137_v53, %v2134_v48  ;;  %v952_v48 = vmul.f32 %v2144_v61, %v1937_v25 }
  0xf7   : > { %v1406_v49 = vpop.eup %1405  ;;  %v518_v58 = vadd.f32 %v2118_v5, %v517_v15  ;;  %v566_v59 = vadd.f32 %v2118_v5, %v565_v0  ;;  %v2178_v15 = vld [vmem:[%s1891_s12 + $0x48] sm:$0xff]  ;;  %v792_v25 = vmul.f32 %v2137_v53, %v2149_v2  ;;  %v921_v2 = vmul.f32 %v2144_v61, %v1959_v31 }
  0xf8   : > { %v1408_v62 = vpop.eup %1407  ;;  %v837_v51 = vsub.f32 %v1406_v49, %v773_v4  ;;  %1081 = vst [vmem:[%s2059_s6 + $0x330] sm:$0xff] %v464_v63  ;;  %v417_v14 = vsub.f32 0.0, %v2178_v15  ;;  %v824_v31 = vmul.f32 %v2137_v53, %v2170_v10  ;;  %v953_v10 = vmul.f32 %v2144_v61, %v1953_v29 }
  0xf9   : > { %v853_v7 = vsub.f32 %v1408_v62, %v789_v11  ;;  %1413 = vtanh.f32 %v518_v58  ;;  %v793_v29 = vmul.f32 %v2137_v53, %v2189_v45 }
  0xfa   : > { %v966_v0 = vadd.f32 %v902_v13, %v837_v51  ;;  %1415 = vtanh.f32 %v566_v59  ;;  %v613_v4 = vpop.f32.mrf.mxu2  ;;  %v661_v49 = vpop.f32.mrf.mxu3  ;;  %v774_v13 = vmul.f32 %v2137_v53, %v2087_v54  ;;  %v433_v59 = vsub.f32 0.0, %v2189_v45  ;;  %1034 = vst [vmem:[%s2059_s6 + $0x40] sm:$0xff] %v417_v14 }
  0xfb   : > { %v1410_v11 = vpop.eup %1409  ;;  %v982_v58 = vadd.f32 %v918_v57, %v853_v7  ;;  %v614_v62 = vadd.f32 %v2118_v5, %v613_v4  ;;  %v662_v50 = vadd.f32 %v2118_v5, %v661_v49  ;;  %v2199_v57 = vld [vmem:[%s1891_s12 + $0x248] sm:$0xff]  ;;  %v903_v7 = vmul.f32 %v2144_v61, %v1924_v22 }
  0xfc   : > { %v1412_v16 = vpop.eup %1411  ;;  %1094 = vst [vmem:[%s2059_s6 + $0x8] sm:$0xff] %v966_v0  ;;  %v869_v51 = vsub.f32 %v1410_v11, %v805_v18  ;;  %v2211_v22 = vld [vmem:[%s1891_s12 + $0x348] sm:$0xff]  ;;  %v806_v14 = vmul.f32 %v2137_v53, %v2099_v60  ;;  %v922_v45 = vmul.f32 %v2144_v61, %v1975_v35 }
  0xfd   : > { %1110 = vst [vmem:[%s2059_s6 + $0x108] sm:$0xff] %v982_v58  ;;  %v885_v63 = vsub.f32 %v1412_v16, %v821_v19  ;;  %1417 = vtanh.f32 %v614_v62  ;;  %v449_v19 = vsub.f32 0.0, %v2199_v57  ;;  %v465_v62 = vsub.f32 0.0, %v2211_v22 }
  0xfe   : > { %v998_v18 = vadd.f32 %v934_v12, %v869_v51  ;;  %1419 = vtanh.f32 %v662_v50  ;;  %v520_v0 = vpop.f32.mrf.mxu0  ;;  %v568_v54 = vpop.f32.mrf.mxu1  ;;  %1050 = vst [vmem:[%s2059_s6 + $0x140] sm:$0xff] %v433_v59  ;;  %v935_v51 = vmul.f32 %v2144_v61, %v1918_v20  ;;  %v2233_v20 = vld [vmem:[%s1891_s12 + $0x158] sm:$0xff]  ;;  %v825_v35 = vmul.f32 %v2137_v53, %v2211_v22 }
  0xff   : > { %v1414_v4 = vpop.eup %1413  ;;  %v1014_v49 = vadd.f32 %v950_v52, %v885_v63  ;;  %v521_v11 = vadd.f32 %v2118_v5, %v520_v0  ;;  %v569_v58 = vadd.f32 %v2118_v5, %v568_v54  ;;  %v2221_v52 = vld [vmem:[%s1891_s12 + $0x58] sm:$0xff]  ;;  %1066 = vst [vmem:[%s2059_s6 + $0x240] sm:$0xff] %v449_v19  ;;  %v775_v19 = vmul.f32 %v2137_v53, %v2111_v3 }
 0x100   : > { %v1416_v50 = vpop.eup %1415  ;;  %1126 = vst [vmem:[%s2059_s6 + $0x208] sm:$0xff] %v998_v18  ;;  %v838_v12 = vsub.f32 %v1414_v4, %v774_v13  ;;  %v418_v63 = vsub.f32 0.0, %v2221_v52  ;;  %v954_v22 = vmul.f32 %v2144_v61, %v1969_v33  ;;  %v794_v33 = vmul.f32 %v2137_v53, %v2233_v20 }
 0x101   : > { %1142 = vst [vmem:[%s2059_s6 + $0x308] sm:$0xff] %v1014_v49  ;;  %v854_v16 = vsub.f32 %v1416_v50, %v790_v17  ;;  %1421 = vtanh.f32 %v521_v11  ;;  %v434_v49 = vsub.f32 0.0, %v2233_v20  ;;  %v923_v20 = vmul.f32 %v2144_v61, %v1991_v39 }
 0x102   : > { %v967_v13 = vadd.f32 %v903_v7, %v838_v12  ;;  %1423 = vtanh.f32 %v569_v58  ;;  %v616_v59 = vpop.f32.mrf.mxu2  ;;  %v664_v60 = vpop.f32.mrf.mxu3  ;;  %1082 = vst [vmem:[%s2059_s6 + $0x340] sm:$0xff] %v465_v62  ;;  %v904_v58 = vmul.f32 %v2144_v61, %v1940_v26  ;;  %v2255_v26 = vld [vmem:[%s1891_s12 + $0x358] sm:$0xff] }
 0x103   : > { %v1418_v17 = vpop.eup %1417  ;;  %v983_v18 = vadd.f32 %v919_v56, %v854_v16  ;;  %v617_v0 = vadd.f32 %v2118_v5, %v616_v59  ;;  %v665_v54 = vadd.f32 %v2118_v5, %v664_v60  ;;  %v2243_v56 = vld [vmem:[%s1891_s12 + $0x258] sm:$0xff]  ;;  %1035 = vst [vmem:[%s2059_s6 + $0x50] sm:$0xff] %v418_v63  ;;  %v807_v60 = vmul.f32 %v2137_v53, %v2126_v8 }
 0x104   : > { %v1420_v7 = vpop.eup %1419  ;;  %1095 = vst [vmem:[%s2059_s6 + $0x18] sm:$0xff] %v967_v13  ;;  %v870_v4 = vsub.f32 %v1418_v17, %v806_v14  ;;  %v450_v14 = vsub.f32 0.0, %v2243_v56  ;;  %v466_v63 = vsub.f32 0.0, %v2255_v26  ;;  %v826_v39 = vmul.f32 %v2137_v53, %v2255_v26 }
 0x105   : > { %1111 = vst [vmem:[%s2059_s6 + $0x118] sm:$0xff] %v983_v18  ;;  %v886_v11 = vsub.f32 %v1420_v7, %v822_v23  ;;  %1425 = vtanh.f32 %v617_v0  ;;  %v936_v18 = vmul.f32 %v2144_v61, %v1934_v24  ;;  %v2277_v24 = vld [vmem:[%s1891_s12 + $0x168] sm:$0xff]  ;;  %v955_v26 = vmul.f32 %v2144_v61, %v1985_v37 }
 0x106   : > { %v999_v50 = vadd.f32 %v935_v51, %v870_v4  ;;  %1427 = vtanh.f32 %v665_v54  ;;  %v523_v12 = vpop.f32.mrf.mxu0  ;;  %v571_v3 = vpop.f32.mrf.mxu1  ;;  %1051 = vst [vmem:[%s2059_s6 + $0x150] sm:$0xff] %v434_v49  ;;  %v795_v37 = vmul.f32 %v2137_v53, %v2277_v24 }
 0x107   : > { %v1422_v62 = vpop.eup %1421  ;;  %v1015_v16 = vadd.f32 %v951_v1, %v886_v11  ;;  %v524_v23 = vadd.f32 %v2118_v5, %v523_v12  ;;  %v572_v13 = vadd.f32 %v2118_v5, %v571_v3  ;;  %v2265_v1 = vld [vmem:[%s1891_s12 + $0x68] sm:$0xff]  ;;  %1067 = vst [vmem:[%s2059_s6 + $0x250] sm:$0xff] %v450_v14  ;;  %v435_v12 = vsub.f32 0.0, %v2277_v24 }
 0x108   : > { %v1424_v51 = vpop.eup %1423  ;;  %1127 = vst [vmem:[%s2059_s6 + $0x218] sm:$0xff] %v999_v50  ;;  %v839_v59 = vsub.f32 %v1422_v62, %v775_v19  ;;  %v419_v7 = vsub.f32 0.0, %v2265_v1  ;;  %v776_v50 = vmul.f32 %v2137_v53, %v2140_v55  ;;  %v2287_v14 = vld [vmem:[%s1891_s12 + $0x268] sm:$0xff]  ;;  %v905_v62 = vmul.f32 %v2144_v61, %v1956_v30 }
 0x109   : > { %1143 = vst [vmem:[%s2059_s6 + $0x318] sm:$0xff] %v1015_v16  ;;  %v855_v17 = vsub.f32 %v1424_v51, %v791_v21  ;;  %1429 = vtanh.f32 %v524_v23  ;;  %v451_v23 = vsub.f32 0.0, %v2287_v14  ;;  %v2299_v30 = vld [vmem:[%s1891_s12 + $0x368] sm:$0xff]  ;;  %v924_v24 = vmul.f32 %v2144_v61, %v2007_v43 }
 0x10a   : > { %v968_v0 = vadd.f32 %v904_v58, %v839_v59  ;;  %1431 = vtanh.f32 %v572_v13  ;;  %v619_v54 = vpop.f32.mrf.mxu2  ;;  %v667_v8 = vpop.f32.mrf.mxu3  ;;  %1083 = vst [vmem:[%s2059_s6 + $0x350] sm:$0xff] %v466_v63  ;;  %v827_v43 = vmul.f32 %v2137_v53, %v2299_v30 }
 0x10b   : > { %v1426_v4 = vpop.eup %1425  ;;  %v984_v19 = vadd.f32 %v920_v6, %v855_v17  ;;  %v620_v49 = vadd.f32 %v2118_v5, %v619_v54  ;;  %v668_v11 = vadd.f32 %v2118_v5, %v667_v8  ;;  %1036 = vst [vmem:[%s2059_s6 + $0x60] sm:$0xff] %v419_v7  ;;  %v2309_v54 = vld [vmem:[%s1891_s12 + $0x78] sm:$0xff]  ;;  %v937_v8 = vmul.f32 %v2144_v61, %v1950_v28 }
 0x10c   : > { %v1428_v21 = vpop.eup %1427  ;;  %1096 = vst [vmem:[%s2059_s6 + $0x28] sm:$0xff] %v968_v0  ;;  %v871_v58 = vsub.f32 %v1426_v4, %v807_v60  ;;  %v2321_v28 = vld [vmem:[%s1891_s12 + $0x178] sm:$0xff] }
 0x10d   : > { %1112 = vst [vmem:[%s2059_s6 + $0x128] sm:$0xff] %v984_v19  ;;  %v887_v3 = vsub.f32 %v1428_v21, %v823_v27  ;;  %1433 = vtanh.f32 %v620_v49  ;;  %v808_v27 = vmul.f32 %v2137_v53, %v2156_v9 }
 0x10e   : > { %v1000_v6 = vadd.f32 %v936_v18, %v871_v58  ;;  %1435 = vtanh.f32 %v668_v11  ;;  %v526_v16 = vpop.f32.mrf.mxu0  ;;  %v574_v55 = vpop.f32.mrf.mxu1  ;;  %1052 = vst [vmem:[%s2059_s6 + $0x160] sm:$0xff] %v435_v12  ;;  %v467_v18 = vsub.f32 0.0, %v2299_v30  ;;  %v777_v12 = vmul.f32 %v2137_v53, %v2178_v15 }
 0x10f   : > { %v1430_v13 = vpop.eup %1429  ;;  %v1016_v51 = vadd.f32 %v952_v48, %v887_v3  ;;  %v527_v59 = vadd.f32 %v2118_v5, %v526_v16  ;;  %v575_v60 = vadd.f32 %v2118_v5, %v574_v55  ;;  %1068 = vst [vmem:[%s2059_s6 + $0x260] sm:$0xff] %v451_v23  ;;  %v420_v48 = vsub.f32 0.0, %v2309_v54 }
 0x110   : > { %v1432_v63 = vpop.eup %1431  ;;  %1128 = vst [vmem:[%s2059_s6 + $0x228] sm:$0xff] %v1000_v6  ;;  %v840_v17 = vsub.f32 %v1430_v13, %v776_v50  ;;  %v436_v3 = vsub.f32 0.0, %v2321_v28  ;;  %v906_v6 = vmul.f32 %v2144_v61, %v1972_v34  ;;  %v2343_v34 = vld [vmem:[%s1891_s12 + $0x378] sm:$0xff]  ;;  %v956_v30 = vmul.f32 %v2144_v61, %v2001_v41 }
 0x111   : > { %1144 = vst [vmem:[%s2059_s6 + $0x328] sm:$0xff] %v1016_v51  ;;  %v856_v0 = vsub.f32 %v1432_v63, %v792_v25  ;;  %1437 = vtanh.f32 %v527_v59  ;;  %v796_v41 = vmul.f32 %v2137_v53, %v2321_v28  ;;  %v925_v28 = vmul.f32 %v2144_v61, %v2023_v47 }
 0x112   : > { %v969_v7 = vadd.f32 %v905_v62, %v840_v17  ;;  %1439 = vtanh.f32 %v575_v60  ;;  %v622_v4 = vpop.f32.mrf.mxu2  ;;  %v670_v9 = vpop.f32.mrf.mxu3  ;;  %1084 = vst [vmem:[%s2059_s6 + $0x360] sm:$0xff] %v467_v18  ;;  %v2331_v62 = vld [vmem:[%s1891_s12 + $0x278] sm:$0xff]  ;;  %v809_v17 = vmul.f32 %v2137_v53, %v2199_v57  ;;  %v828_v47 = vmul.f32 %v2137_v53, %v2343_v34 }
 0x113   : > { %v1434_v19 = vpop.eup %1433  ;;  %v985_v49 = vadd.f32 %v921_v2, %v856_v0  ;;  %v623_v11 = vadd.f32 %v2118_v5, %v622_v4  ;;  %v671_v21 = vadd.f32 %v2118_v5, %v670_v9  ;;  %1037 = vst [vmem:[%s2059_s6 + $0x70] sm:$0xff] %v420_v48  ;;  %v452_v23 = vsub.f32 0.0, %v2331_v62  ;;  %v2353_v0 = vld [vmem:[%s1891_s12 + $0x88] sm:$0xff] }
 0x114   : > { %v1436_v58 = vpop.eup %1435  ;;  %1097 = vst [vmem:[%s2059_s6 + $0x38] sm:$0xff] %v969_v7  ;;  %v872_v50 = vsub.f32 %v1434_v19, %v808_v27  ;;  %v468_v27 = vsub.f32 0.0, %v2343_v34  ;;  %v421_v4 = vsub.f32 0.0, %v2353_v0 }
 0x115   : > { %1113 = vst [vmem:[%s2059_s6 + $0x138] sm:$0xff] %v985_v49  ;;  %v888_v25 = vsub.f32 %v1436_v58, %v824_v31  ;;  %1441 = vtanh.f32 %v623_v11  ;;  %v938_v31 = vmul.f32 %v2144_v61, %v1966_v32  ;;  %v2365_v32 = vld [vmem:[%s1891_s12 + $0x188] sm:$0xff] }
 0x116   : > { %v1001_v16 = vadd.f32 %v937_v8, %v872_v50  ;;  %1443 = vtanh.f32 %v671_v21  ;;  %v529_v55 = vpop.f32.mrf.mxu0  ;;  %v577_v15 = vpop.f32.mrf.mxu1  ;;  %1053 = vst [vmem:[%s2059_s6 + $0x170] sm:$0xff] %v436_v3  ;;  %v778_v21 = vmul.f32 %v2137_v53, %v2221_v52  ;;  %v437_v58 = vsub.f32 0.0, %v2365_v32 }
 0x117   : > { %v1438_v13 = vpop.eup %1437  ;;  %v1017_v2 = vadd.f32 %v953_v10, %v888_v25  ;;  %v530_v51 = vadd.f32 %v2118_v5, %v529_v55  ;;  %v578_v59 = vadd.f32 %v2118_v5, %v577_v15  ;;  %1069 = vst [vmem:[%s2059_s6 + $0x270] sm:$0xff] %v452_v23  ;;  %v907_v3 = vmul.f32 %v2144_v61, %v1988_v38  ;;  %v2387_v38 = vld [vmem:[%s1891_s12 + $0x388] sm:$0xff] }
 0x118   : > { %v1440_v60 = vpop.eup %1439  ;;  %1129 = vst [vmem:[%s2059_s6 + $0x238] sm:$0xff] %v1001_v16  ;;  %v841_v63 = vsub.f32 %v1438_v13, %v777_v12  ;;  %v2375_v12 = vld [vmem:[%s1891_s12 + $0x288] sm:$0xff] }
 0x119   : > { %1145 = vst [vmem:[%s2059_s6 + $0x338] sm:$0xff] %v1017_v2  ;;  %v857_v18 = vsub.f32 %v1440_v60, %v793_v29  ;;  %1445 = vtanh.f32 %v530_v51  ;;  %v810_v2 = vmul.f32 %v2137_v53, %v2243_v56  ;;  %v469_v51 = vsub.f32 0.0, %v2387_v38  ;;  %v2397_v60 = vld [vmem:[%s1891_s12 + $0x98] sm:$0xff] }
 0x11a   : > { %v970_v8 = vadd.f32 %v906_v6, %v841_v63  ;;  %1447 = vtanh.f32 %v578_v59  ;;  %v625_v7 = vpop.f32.mrf.mxu2  ;;  %v673_v57 = vpop.f32.mrf.mxu3  ;;  %1085 = vst [vmem:[%s2059_s6 + $0x370] sm:$0xff] %v468_v27  ;;  %v453_v6 = vsub.f32 0.0, %v2375_v12  ;;  %v939_v63 = vmul.f32 %v2144_v61, %v1982_v36  ;;  %v2409_v36 = vld [vmem:[%s1891_s12 + $0x198] sm:$0xff] }
 0x11b   : > { %v1442_v9 = vpop.eup %1441  ;;  %v986_v48 = vadd.f32 %v922_v45, %v857_v18  ;;  %v626_v19 = vadd.f32 %v2118_v5, %v625_v7  ;;  %v674_v10 = vadd.f32 %v2118_v5, %v673_v57  ;;  %1038 = vst [vmem:[%s2059_s6 + $0x80] sm:$0xff] %v421_v4  ;;  %v422_v18 = vsub.f32 0.0, %v2397_v60 }
 0x11c   : > { %v1444_v49 = vpop.eup %1443  ;;  %1098 = vst [vmem:[%s2059_s6 + $0x48] sm:$0xff] %v970_v8  ;;  %v873_v11 = vsub.f32 %v1442_v9, %v809_v17  ;;  %v779_v9 = vmul.f32 %v2137_v53, %v2265_v1 }
 0x11d   : > { %1114 = vst [vmem:[%s2059_s6 + $0x148] sm:$0xff] %v986_v48  ;;  %v889_v50 = vsub.f32 %v1444_v49, %v825_v35  ;;  %1449 = vtanh.f32 %v626_v19  ;;  %v2419_v19 = vld [vmem:[%s1891_s12 + $0x298] sm:$0xff] }
 0x11e   : > { %v1002_v25 = vadd.f32 %v938_v31, %v873_v11  ;;  %1451 = vtanh.f32 %v674_v10  ;;  %v532_v29 = vpop.f32.mrf.mxu0  ;;  %v580_v52 = vpop.f32.mrf.mxu1  ;;  %1054 = vst [vmem:[%s2059_s6 + $0x180] sm:$0xff] %v437_v58  ;;  %v908_v10 = vmul.f32 %v2144_v61, %v2004_v42  ;;  %v2431_v42 = vld [vmem:[%s1891_s12 + $0x398] sm:$0xff] }
 0x11f   : > { %v1446_v16 = vpop.eup %1445  ;;  %v1018_v55 = vadd.f32 %v954_v22, %v889_v50  ;;  %v533_v15 = vadd.f32 %v2118_v5, %v532_v29  ;;  %v581_v23 = vadd.f32 %v2118_v5, %v580_v52  ;;  %1070 = vst [vmem:[%s2059_s6 + $0x280] sm:$0xff] %v453_v6  ;;  %v438_v22 = vsub.f32 0.0, %v2409_v36 }
 0x120   : > { %v1448_v13 = vpop.eup %1447  ;;  %1130 = vst [vmem:[%s2059_s6 + $0x248] sm:$0xff] %v1002_v25  ;;  %v842_v45 = vsub.f32 %v1446_v16, %v778_v21  ;;  %v454_v21 = vsub.f32 0.0, %v2419_v19  ;;  %v811_v52 = vmul.f32 %v2137_v53, %v2287_v14  ;;  %v470_v6 = vsub.f32 0.0, %v2431_v42 }
 0x121   : > { %1146 = vst [vmem:[%s2059_s6 + $0x348] sm:$0xff] %v1018_v55  ;;  %v858_v59 = vsub.f32 %v1448_v13, %v794_v33  ;;  %1453 = vtanh.f32 %v533_v15  ;;  %v940_v55 = vmul.f32 %v2144_v61, %v1998_v40  ;;  %v2453_v40 = vld [vmem:[%s1891_s12 + $0x1a8] sm:$0xff] }
 0x122   : > { %v971_v17 = vadd.f32 %v907_v3, %v842_v45  ;;  %1455 = vtanh.f32 %v581_v23  ;;  %v628_v27 = vpop.f32.mrf.mxu2  ;;  %v676_v56 = vpop.f32.mrf.mxu3  ;;  %1086 = vst [vmem:[%s2059_s6 + $0x380] sm:$0xff] %v469_v51 }
 0x123   : > { %v1450_v35 = vpop.eup %1449  ;;  %v987_v31 = vadd.f32 %v923_v20, %v858_v59  ;;  %v629_v8 = vadd.f32 %v2118_v5, %v628_v27  ;;  %v677_v7 = vadd.f32 %v2118_v5, %v676_v56  ;;  %1039 = vst [vmem:[%s2059_s6 + $0x90] sm:$0xff] %v422_v18  ;;  %v2441_v20 = vld [vmem:[%s1891_s12 + $0xa8] sm:$0xff]  ;;  %v439_v27 = vsub.f32 0.0, %v2453_v40 }
 0x124   : > { %v1452_v57 = vpop.eup %1451  ;;  %1099 = vst [vmem:[%s2059_s6 + $0x58] sm:$0xff] %v971_v17  ;;  %v874_v4 = vsub.f32 %v1450_v35, %v810_v2  ;;  %v423_v13 = vsub.f32 0.0, %v2441_v20  ;;  %v780_v17 = vmul.f32 %v2137_v53, %v2309_v54  ;;  %v2463_v18 = vld [vmem:[%s1891_s12 + $0x2a8] sm:$0xff]  ;;  %v909_v35 = vmul.f32 %v2144_v61, %v2020_v46 }
 0x125   : > { %1115 = vst [vmem:[%s2059_s6 + $0x158] sm:$0xff] %v987_v31  ;;  %v890_v48 = vsub.f32 %v1452_v57, %v826_v39  ;;  %1457 = vtanh.f32 %v629_v8  ;;  %v455_v8 = vsub.f32 0.0, %v2463_v18  ;;  %v2475_v46 = vld [vmem:[%s1891_s12 + $0x3a8] sm:$0xff] }
 0x126   : > { %v1003_v49 = vadd.f32 %v939_v63, %v874_v4  ;;  %1459 = vtanh.f32 %v677_v7  ;;  %v535_v11 = vpop.f32.mrf.mxu0  ;;  %v583_v1 = vpop.f32.mrf.mxu1  ;;  %1055 = vst [vmem:[%s2059_s6 + $0x190] sm:$0xff] %v438_v22 }
 0x127   : > { %v1454_v58 = vpop.eup %1453  ;;  %v1019_v50 = vadd.f32 %v955_v26, %v890_v48  ;;  %v536_v33 = vadd.f32 %v2118_v5, %v535_v11  ;;  %v584_v3 = vadd.f32 %v2118_v5, %v583_v1  ;;  %1071 = vst [vmem:[%s2059_s6 + $0x290] sm:$0xff] %v454_v21  ;;  %v2485_v11 = vld [vmem:[%s1891_s12 + $0xb8] sm:$0xff]  ;;  %v941_v1 = vmul.f32 %v2144_v61, %v2014_v44 }
 0x128   : > { %v1456_v25 = vpop.eup %1455  ;;  %1131 = vst [vmem:[%s2059_s6 + $0x258] sm:$0xff] %v1003_v49  ;;  %v843_v29 = vsub.f32 %v1454_v58, %v779_v9  ;;  %v2497_v44 = vld [vmem:[%s1891_s12 + $0x1b8] sm:$0xff] }
 0x129   : > { %1147 = vst [vmem:[%s2059_s6 + $0x358] sm:$0xff] %v1019_v50  ;;  %v859_v16 = vsub.f32 %v1456_v25, %v795_v37  ;;  %1461 = vtanh.f32 %v536_v33  ;;  %v812_v37 = vmul.f32 %v2137_v53, %v2331_v62  ;;  %v2874_v33 = vld [vmem:[#allocation13_spill] sm:$0xff] }
 0x12a   : > { %v972_v15 = vadd.f32 %v908_v10, %v843_v29  ;;  %1463 = vtanh.f32 %v584_v3  ;;  %v631_v23 = vpop.f32.mrf.mxu2  ;;  %v679_v14 = vpop.f32.mrf.mxu3  ;;  %1087 = vst [vmem:[%s2059_s6 + $0x390] sm:$0xff] %v470_v6  ;;  %v471_v10 = vsub.f32 0.0, %v2475_v46  ;;  %v957_v34 = vmul.f32 %v2144_v61, %v2874_v33  ;;  %v2551_v33 = vld [vmem:[%s1891_s12 + $0x2c8] sm:$0xff] }
 0x12b   : > { %v1458_v45 = vpop.eup %1457  ;;  %v988_v2 = vadd.f32 %v924_v24, %v859_v16  ;;  %v632_v51 = vadd.f32 %v2118_v5, %v631_v23  ;;  %v680_v59 = vadd.f32 %v2118_v5, %v679_v14  ;;  %1040 = vst [vmem:[%s2059_s6 + $0xa0] sm:$0xff] %v423_v13  ;;  %v424_v24 = vsub.f32 0.0, %v2485_v11  ;;  %v2507_v23 = vld [vmem:[%s1891_s12 + $0x2b8] sm:$0xff]  ;;  %v2875_v14 = vld [vmem:[#allocation14_spill] sm:$0xff] }
 0x12c   : > { %v1460_v39 = vpop.eup %1459  ;;  %1100 = vst [vmem:[%s2059_s6 + $0x68] sm:$0xff] %v972_v15  ;;  %v875_v63 = vsub.f32 %v1458_v45, %v811_v52  ;;  %v781_v16 = vmul.f32 %v2137_v53, %v2353_v0  ;;  %v797_v15 = vmul.f32 %v2137_v53, %v2365_v32  ;;  %v910_v13 = vmul.f32 %v2144_v61, %v2875_v14  ;;  %v2563_v14 = vld [vmem:[%s1891_s12 + $0x3c8] sm:$0xff] }
 0x12d   : > { %1116 = vst [vmem:[%s2059_s6 + $0x168] sm:$0xff] %v988_v2  ;;  %v891_v56 = vsub.f32 %v1460_v39, %v827_v43  ;;  %1465 = vtanh.f32 %v632_v51  ;;  %v440_v43 = vsub.f32 0.0, %v2497_v44  ;;  %v456_v2 = vsub.f32 0.0, %v2507_v23 }
 0x12e   : > { %v1004_v26 = vadd.f32 %v940_v55, %v875_v63  ;;  %1467 = vtanh.f32 %v680_v59  ;;  %v538_v31 = vpop.f32.mrf.mxu0  ;;  %v586_v54 = vpop.f32.mrf.mxu1  ;;  %1056 = vst [vmem:[%s2059_s6 + $0x1a0] sm:$0xff] %v439_v27  ;;  %v2876_v59 = vld [vmem:[#allocation15_spill] sm:$0xff]  ;;  %v2519_v27 = vld [vmem:[%s1891_s12 + $0x3b8] sm:$0xff] }
 0x12f   : > { %v1462_v7 = vpop.eup %1461  ;;  %v1020_v57 = vadd.f32 %v956_v30, %v891_v56  ;;  %v539_v4 = vadd.f32 %v2118_v5, %v538_v31  ;;  %v587_v9 = vadd.f32 %v2118_v5, %v586_v54  ;;  %1072 = vst [vmem:[%s2059_s6 + $0x2a0] sm:$0xff] %v455_v8  ;;  %v926_v32 = vmul.f32 %v2144_v61, %v2876_v59  ;;  %v2529_v8 = vld [vmem:[%s1891_s12 + $0xc8] sm:$0xff]  ;;  %v2573_v59 = vld [vmem:[%s1891_s12 + $0xd8] sm:$0xff] }
 0x130   : > { %v1464_v22 = vpop.eup %1463  ;;  %1132 = vst [vmem:[%s2059_s6 + $0x268] sm:$0xff] %v1004_v26  ;;  %v844_v48 = vsub.f32 %v1462_v7, %v780_v17  ;;  %v472_v26 = vsub.f32 0.0, %v2519_v27  ;;  %v829_v54 = vmul.f32 %v2137_v53, %v2387_v38  ;;  %v1533_v7 = vld [vmem:[%s1891_s12 + $0x280] sm:$0xff] }
 0x131   : > { %1148 = vst [vmem:[%s2059_s6 + $0x368] sm:$0xff] %v1020_v57  ;;  %v860_v49 = vsub.f32 %v1464_v22, %v796_v41  ;;  %1469 = vtanh.f32 %v539_v4 }
 0x132   : > { %v973_v21 = vadd.f32 %v909_v35, %v844_v48  ;;  %1471 = vtanh.f32 %v587_v9  ;;  %v634_v58 = vpop.f32.mrf.mxu2  ;;  %v682_v62 = vpop.f32.mrf.mxu3  ;;  %1088 = vst [vmem:[%s2059_s6 + $0x3a0] sm:$0xff] %v471_v10  ;;  %v813_v35 = vmul.f32 %v2137_v53, %v2375_v12  ;;  %v425_v9 = vsub.f32 0.0, %v2529_v8  ;;  %v1534_v48 = vld [vmem:[%s1891_s12 + $0x380] sm:$0xff] }
 0x133   : > { %v1466_v50 = vpop.eup %1465  ;;  %v989_v3 = vadd.f32 %v925_v28, %v860_v49  ;;  %v635_v25 = vadd.f32 %v2118_v5, %v634_v58  ;;  %v683_v29 = vadd.f32 %v2118_v5, %v682_v62  ;;  %1041 = vst [vmem:[%s2059_s6 + $0xb0] sm:$0xff] %v424_v24  ;;  %v942_v28 = vmul.f32 %v1533_v7, %v2144_v61  ;;  %v2585_v7 = vld [vmem:[%s1891_s12 + $0x1d8] sm:$0xff] }
 0x134   : > { %v1468_v52 = vpop.eup %1467  ;;  %1101 = vst [vmem:[%s2059_s6 + $0x78] sm:$0xff] %v973_v21  ;;  %v876_v6 = vsub.f32 %v1466_v50, %v812_v37  ;;  %v958_v38 = vmul.f32 %v1534_v48, %v2144_v61  ;;  %v782_v58 = vmul.f32 %v2137_v53, %v2397_v60  ;;  %v798_v50 = vmul.f32 %v2137_v53, %v2409_v36  ;;  %v1539_v48 = vld [vmem:[%s1891_s12 + $0xa0] sm:$0xff] }
 0x135   : > { %1117 = vst [vmem:[%s2059_s6 + $0x178] sm:$0xff] %v989_v3  ;;  %v892_v55 = vsub.f32 %v1468_v52, %v828_v47  ;;  %1473 = vtanh.f32 %v635_v25  ;;  %v2541_v47 = vld [vmem:[%s1891_s12 + $0x1c8] sm:$0xff]  ;;  %v457_v52 = vsub.f32 0.0, %v2551_v33 }
 0x136   : > { %v1005_v45 = vadd.f32 %v941_v1, %v876_v6  ;;  %1475 = vtanh.f32 %v683_v29  ;;  %v541_v30 = vpop.f32.mrf.mxu0  ;;  %v589_v0 = vpop.f32.mrf.mxu1  ;;  %1057 = vst [vmem:[%s2059_s6 + $0x1b0] sm:$0xff] %v440_v43  ;;  %v441_v62 = vsub.f32 0.0, %v2541_v47 }
 0x137   : > { %v1470_v51 = vpop.eup %1469  ;;  %v1021_v39 = vadd.f32 %v957_v34, %v892_v55  ;;  %v542_v63 = vadd.f32 %v2118_v5, %v541_v30  ;;  %v590_v17 = vadd.f32 %v2118_v5, %v589_v0  ;;  %1073 = vst [vmem:[%s2059_s6 + $0x2b0] sm:$0xff] %v456_v2  ;;  %v1535_v34 = vld [vmem:[%s1891_s12 + $0x90] sm:$0xff]  ;;  %v814_v30 = vmul.f32 %v2137_v53, %v2419_v19 }
 0x138   : > { %v1472_v56 = vpop.eup %1471  ;;  %1133 = vst [vmem:[%s2059_s6 + $0x278] sm:$0xff] %v1005_v45  ;;  %v845_v41 = vsub.f32 %v1470_v51, %v781_v16  ;;  %v911_v3 = vmul.f32 %v1535_v34, %v2144_v61  ;;  %v1536_v16 = vld [vmem:[%s1891_s12 + $0x190] sm:$0xff]  ;;  %v473_v0 = vsub.f32 0.0, %v2563_v14  ;;  %v830_v51 = vmul.f32 %v2137_v53, %v2431_v42  ;;  %v2612_v34 = vld [vmem:[%s1891_s12 + $0x3d8] sm:$0xff] }
 0x139   : > { %1149 = vst [vmem:[%s2059_s6 + $0x378] sm:$0xff] %v1021_v39  ;;  %v861_v31 = vsub.f32 %v1472_v56, %v797_v15  ;;  %1477 = vtanh.f32 %v542_v63  ;;  %v927_v36 = vmul.f32 %v1536_v16, %v2144_v61  ;;  %v426_v56 = vsub.f32 0.0, %v2573_v59  ;;  %v2622_v16 = vld [vmem:[%s1891_s12 + $0xe8] sm:$0xff] }
 0x13a   : > { %v974_v57 = vadd.f32 %v910_v13, %v845_v41  ;;  %1479 = vtanh.f32 %v590_v17  ;;  %v637_v12 = vpop.f32.mrf.mxu2  ;;  %v685_v4 = vpop.f32.mrf.mxu3  ;;  %1089 = vst [vmem:[%s2059_s6 + $0x3b0] sm:$0xff] %v472_v26 }
 0x13b   : > { %v1474_v22 = vpop.eup %1473  ;;  %v990_v37 = vadd.f32 %v926_v32, %v861_v31  ;;  %v638_v10 = vadd.f32 %v2118_v5, %v637_v12  ;;  %v686_v49 = vadd.f32 %v2118_v5, %v685_v4  ;;  %1042 = vst [vmem:[%s2059_s6 + $0xc0] sm:$0xff] %v425_v9  ;;  %v1537_v32 = vld [vmem:[%s1891_s12 + $0x290] sm:$0xff]  ;;  %v783_v12 = vmul.f32 %v2137_v53, %v2441_v20 }
 0x13c   : > { %v1476_v1 = vpop.eup %1475  ;;  %1102 = vst [vmem:[%s2059_s6 + $0x88] sm:$0xff] %v974_v57  ;;  %v877_v21 = vsub.f32 %v1474_v22, %v813_v35  ;;  %v943_v39 = vmul.f32 %v1537_v32, %v2144_v61  ;;  %v1538_v35 = vld [vmem:[%s1891_s12 + $0x390] sm:$0xff]  ;;  %v442_v4 = vsub.f32 0.0, %v2585_v7  ;;  %v799_v22 = vmul.f32 %v2137_v53, %v2453_v40  ;;  %v2634_v32 = vld [vmem:[%s1891_s12 + $0x1e8] sm:$0xff] }
 0x13d   : > { %1118 = vst [vmem:[%s2059_s6 + $0x188] sm:$0xff] %v990_v37  ;;  %v893_v24 = vsub.f32 %v1476_v1, %v829_v54  ;;  %1481 = vtanh.f32 %v638_v10  ;;  %v959_v42 = vmul.f32 %v1538_v35, %v2144_v61  ;;  %v2644_v35 = vld [vmem:[%s1891_s12 + $0x2e8] sm:$0xff] }
 0x13e   : > { %v1006_v25 = vadd.f32 %v942_v28, %v877_v21  ;;  %1483 = vtanh.f32 %v686_v49  ;;  %v544_v60 = vpop.f32.mrf.mxu0  ;;  %v592_v29 = vpop.f32.mrf.mxu1  ;;  %1058 = vst [vmem:[%s2059_s6 + $0x1c0] sm:$0xff] %v441_v62  ;;  %v1540_v21 = vld [vmem:[%s1891_s12 + $0x1a0] sm:$0xff] }
 0x13f   : > { %v1478_v6 = vpop.eup %1477  ;;  %v1022_v43 = vadd.f32 %v958_v38, %v893_v24  ;;  %v545_v55 = vadd.f32 %v2118_v5, %v544_v60  ;;  %v593_v15 = vadd.f32 %v2118_v5, %v592_v29  ;;  %1074 = vst [vmem:[%s2059_s6 + $0x2c0] sm:$0xff] %v457_v52  ;;  %v912_v38 = vmul.f32 %v1539_v48, %v2144_v61  ;;  %v2606_v62 = vld [vmem:[%s2856_s4] ss:$0 sm:$0xff]  ;;  %v2656_v48 = vld [vmem:[%s1891_s12 + $0x3e8] sm:$0xff] }
 0x140   : > { %v1480_v13 = vpop.eup %1479  ;;  %1134 = vst [vmem:[%s2059_s6 + $0x288] sm:$0xff] %v1006_v25  ;;  %v846_v45 = vsub.f32 %v1478_v6, %v782_v58  ;;  %v928_v40 = vmul.f32 %v1540_v21, %v2144_v61  ;;  %v815_v60 = vmul.f32 %v2137_v53, %v2463_v18  ;;  %v474_v29 = vsub.f32 0.0, %v2612_v34  ;;  %v2666_v21 = vld [vmem:[%s1891_s12 + $0xf8] sm:$0xff] }
 0x141   : > { %1150 = vst [vmem:[%s2059_s6 + $0x388] sm:$0xff] %v1022_v43  ;;  %v862_v2 = vsub.f32 %v1480_v13, %v798_v50  ;;  %1485 = vtanh.f32 %v545_v55  ;;  %v831_v6 = vmul.f32 %v2137_v53, %v2475_v46  ;;  %v427_v13 = vsub.f32 0.0, %v2622_v16 }
 0x142   : > { %v975_v63 = vadd.f32 %v911_v3, %v846_v45  ;;  %1487 = vtanh.f32 %v593_v15  ;;  %v640_v19 = vpop.f32.mrf.mxu2  ;;  %v688_v17 = vpop.f32.mrf.mxu3  ;;  %1090 = vst [vmem:[%s2059_s6 + $0x3c0] sm:$0xff] %v473_v0 }
 0x143   : > { %v1482_v41 = vpop.eup %1481  ;;  %v991_v26 = vadd.f32 %v927_v36, %v862_v2  ;;  %v641_v31 = vadd.f32 %v2118_v5, %v640_v19  ;;  %v689_v54 = vadd.f32 %v2118_v5, %v688_v17  ;;  %v2595_v5 = vld [vmem:[%s1891_s12 + $0x2d8] sm:$0xff]  ;;  %1043 = vst [vmem:[%s2059_s6 + $0xd0] sm:$0xff] %v426_v56  ;;  %v1542_v36 = vld [vmem:[%s1891_s12 + $0x2a0] sm:$0xff]  ;;  %v784_v19 = vmul.f32 %v2137_v53, %v2485_v11 }
 0x144   : > { %v1484_v28 = vpop.eup %1483  ;;  %1103 = vst [vmem:[%s2059_s6 + $0x98] sm:$0xff] %v975_v63  ;;  %v878_v57 = vsub.f32 %v1482_v41, %v814_v30  ;;  %v458_v49 = vsub.f32 0.0, %v2595_v5  ;;  %v944_v43 = vmul.f32 %v1542_v36, %v2144_v61  ;;  %v1543_v30 = vld [vmem:[%s1891_s12 + $0x3a0] sm:$0xff]  ;;  %v443_v17 = vsub.f32 0.0, %v2634_v32  ;;  %v2678_v36 = vld [vmem:[%s1891_s12 + $0x1f8] sm:$0xff] }
 0x145   : > { %1119 = vst [vmem:[%s2059_s6 + $0x198] sm:$0xff] %v991_v26  ;;  %v894_v9 = vsub.f32 %v1484_v28, %v830_v51  ;;  %1489 = vtanh.f32 %v641_v31  ;;  %v960_v46 = vmul.f32 %v1543_v30, %v2144_v61  ;;  %v800_v41 = vmul.f32 %v2137_v53, %v2497_v44 }
 0x146   : > { %v1007_v37 = vadd.f32 %v943_v39, %v878_v57  ;;  %1491 = vtanh.f32 %v689_v54  ;;  %v547_v20 = vpop.f32.mrf.mxu0  ;;  %v595_v10 = vpop.f32.mrf.mxu1  ;;  %1059 = vst [vmem:[%s2059_s6 + $0x1d0] sm:$0xff] %v442_v4  ;;  %v459_v28 = vsub.f32 0.0, %v2644_v35 }
 0x147   : > { %v1486_v1 = vpop.eup %1485  ;;  %v1023_v58 = vadd.f32 %v959_v42, %v894_v9  ;;  %v548_v24 = vadd.f32 %v2606_v62, %v547_v20  ;;  %v596_v50 = vadd.f32 %v2606_v62, %v595_v10  ;;  %1075 = vst [vmem:[%s2059_s6 + $0x2d0] sm:$0xff] %v458_v49  ;;  %v1544_v42 = vld [vmem:[%s1891_s12 + $0xb0] sm:$0xff]  ;;  %v816_v20 = vmul.f32 %v2137_v53, %v2507_v23 }
 0x148   : > { %v1488_v3 = vpop.eup %1487  ;;  %1135 = vst [vmem:[%s2059_s6 + $0x298] sm:$0xff] %v1007_v37  ;;  %v847_v25 = vsub.f32 %v1486_v1, %v783_v12  ;;  %v913_v26 = vmul.f32 %v1544_v42, %v2144_v61  ;;  %v1545_v12 = vld [vmem:[%s1891_s12 + $0x1b0] sm:$0xff]  ;;  %v475_v10 = vsub.f32 0.0, %v2656_v48  ;;  %v832_v1 = vmul.f32 %v2137_v53, %v2519_v27 }
 0x149   : > { %1151 = vst [vmem:[%s2059_s6 + $0x398] sm:$0xff] %v1023_v58  ;;  %v863_v52 = vsub.f32 %v1488_v3, %v799_v22  ;;  %1493 = vtanh.f32 %v548_v24  ;;  %v929_v44 = vmul.f32 %v1545_v12, %v2144_v61  ;;  %v428_v3 = vsub.f32 0.0, %v2666_v21  ;;  %v1547_v27 = vld [vmem:[%s1891_s12 + $0x3b0] sm:$0xff]  ;;  %v1550_v12 = vld [vmem:[%s1891_s12 + $0x2c0] sm:$0xff] }
 0x14a   : > { %v976_v55 = vadd.f32 %v912_v38, %v847_v25  ;;  %1495 = vtanh.f32 %v596_v50  ;;  %v643_v18 = vpop.f32.mrf.mxu2  ;;  %v691_v15 = vpop.f32.mrf.mxu3  ;;  %1091 = vst [vmem:[%s2059_s6 + $0x3d0] sm:$0xff] %v474_v29 }
 0x14b   : > { %v1490_v45 = vpop.eup %1489  ;;  %v992_v0 = vadd.f32 %v928_v40, %v863_v52  ;;  %v644_v2 = vadd.f32 %v2606_v62, %v643_v18  ;;  %v692_v51 = vadd.f32 %v2606_v62, %v691_v15  ;;  %1044 = vst [vmem:[%s2059_s6 + $0xe0] sm:$0xff] %v427_v13  ;;  %v1546_v40 = vld [vmem:[%s1891_s12 + $0x2b0] sm:$0xff]  ;;  %v785_v18 = vmul.f32 %v2137_v53, %v2529_v8  ;;  %v1548_v13 = vld [vmem:[%s1891_s12 + $0xc0] sm:$0xff] }
 0x14c   : > { %v1492_v39 = vpop.eup %1491  ;;  %1104 = vst [vmem:[%s2059_s6 + $0xa8] sm:$0xff] %v976_v55  ;;  %v879_v63 = vsub.f32 %v1490_v45, %v815_v60  ;;  %v945_v58 = vmul.f32 %v1546_v40, %v2144_v61  ;;  %v961_v60 = vmul.f32 %v1547_v27, %v2144_v61  ;;  %v444_v15 = vsub.f32 0.0, %v2678_v36 }
 0x14d   : > { %1120 = vst [vmem:[%s2059_s6 + $0x1a8] sm:$0xff] %v992_v0  ;;  %v895_v56 = vsub.f32 %v1492_v39, %v831_v6  ;;  %1497 = vtanh.f32 %v644_v2  ;;  %v914_v45 = vmul.f32 %v1548_v13, %v2144_v61  ;;  %v2690_v0 = vld [vmem:[%s1891_s12 + $0x2f8] sm:$0xff]  ;;  %v1549_v2 = vld [vmem:[%s1891_s12 + $0x1c0] sm:$0xff]  ;;  %v786_v40 = vmul.f32 %v2137_v53, %v2573_v59 }
 0x14e   : > { %v1008_v31 = vadd.f32 %v944_v43, %v879_v63  ;;  %1499 = vtanh.f32 %v692_v51  ;;  %v550_v11 = vpop.f32.mrf.mxu0  ;;  %v598_v54 = vpop.f32.mrf.mxu1  ;;  %1060 = vst [vmem:[%s2059_s6 + $0x1e0] sm:$0xff] %v443_v17  ;;  %v930_v51 = vmul.f32 %v1549_v2, %v2144_v61  ;;  %v2697_v17 = vld [vmem:[%s1891_s12 + $0x3f8] sm:$0xff]  ;;  %v834_v13 = vmul.f32 %v2137_v53, %v2612_v34 }
 0x14f   : > { %v1494_v57 = vpop.eup %1493  ;;  %v1024_v4 = vadd.f32 %v960_v46, %v895_v56  ;;  %v551_v9 = vadd.f32 %v2606_v62, %v550_v11  ;;  %v599_v22 = vadd.f32 %v2606_v62, %v598_v54  ;;  %1076 = vst [vmem:[%s2059_s6 + $0x2e0] sm:$0xff] %v459_v28  ;;  %v801_v46 = vmul.f32 %v2137_v53, %v2541_v47 }
 0x150   : > { %v1496_v38 = vpop.eup %1495  ;;  %1136 = vst [vmem:[%s2059_s6 + $0x2a8] sm:$0xff] %v1008_v31  ;;  %v848_v37 = vsub.f32 %v1494_v57, %v784_v19  ;;  %v460_v19 = vsub.f32 0.0, %v2690_v0  ;;  %v817_v54 = vmul.f32 %v2137_v53, %v2551_v33  ;;  %v833_v57 = vmul.f32 %v2137_v53, %v2563_v14  ;;  %v1551_v33 = vld [vmem:[%s1891_s12 + $0x3c0] sm:$0xff] }
 0x151   : > { %1152 = vst [vmem:[%s2059_s6 + $0x3a8] sm:$0xff] %v1024_v4  ;;  %v864_v49 = vsub.f32 %v1496_v38, %v800_v41  ;;  %1501 = vtanh.f32 %v551_v9 }
 0x152   : > { %v977_v24 = vadd.f32 %v913_v26, %v848_v37  ;;  %1503 = vtanh.f32 %v599_v22  ;;  %v646_v23 = vpop.f32.mrf.mxu2  ;;  %v694_v50 = vpop.f32.mrf.mxu3  ;;  %1092 = vst [vmem:[%s2059_s6 + $0x3e0] sm:$0xff] %v475_v10  ;;  %v476_v26 = vsub.f32 0.0, %v2697_v17  ;;  %v962_v37 = vmul.f32 %v1551_v33, %v2144_v61 }
 0x153   : > { %v1498_v25 = vpop.eup %1497  ;;  %v993_v29 = vadd.f32 %v929_v44, %v864_v49  ;;  %v647_v52 = vadd.f32 %v2606_v62, %v646_v23  ;;  %v695_v6 = vadd.f32 %v2606_v62, %v694_v50  ;;  %1045 = vst [vmem:[%s2059_s6 + $0xf0] sm:$0xff] %v428_v3  ;;  %v946_v44 = vmul.f32 %v1550_v12, %v2144_v61  ;;  %v1552_v23 = vld [vmem:[%s1891_s12 + $0xd0] sm:$0xff] }
 0x154   : > { %v1500_v43 = vpop.eup %1499  ;;  %1105 = vst [vmem:[%s2059_s6 + $0xb8] sm:$0xff] %v977_v24  ;;  %v880_v55 = vsub.f32 %v1498_v25, %v816_v20  ;;  %v802_v24 = vmul.f32 %v2137_v53, %v2585_v7  ;;  %v915_v50 = vmul.f32 %v1552_v23, %v2144_v61  ;;  %v819_v33 = vmul.f32 %v2137_v53, %v2644_v35 }
 0x155   : > { %1121 = vst [vmem:[%s2059_s6 + $0x1b8] sm:$0xff] %v993_v29  ;;  %v896_v30 = vsub.f32 %v1500_v43, %v832_v1  ;;  %1505 = vtanh.f32 %v647_v52  ;;  %v1553_v29 = vld [vmem:[%s1891_s12 + $0x1d0] sm:$0xff] }
 0x156   : > { %v1009_v8 = vadd.f32 %v945_v58, %v880_v55  ;;  %1507 = vtanh.f32 %v695_v6  ;;  %v553_v39 = vpop.f32.mrf.mxu0  ;;  %v601_v63 = vpop.f32.mrf.mxu1  ;;  %1061 = vst [vmem:[%s2059_s6 + $0x1f0] sm:$0xff] %v444_v15  ;;  %v931_v59 = vmul.f32 %v1553_v29, %v2144_v61  ;;  %v804_v29 = vmul.f32 %v2137_v53, %v2678_v36 }
 0x157   : > { %v1502_v47 = vpop.eup %1501  ;;  %v1025_v56 = vadd.f32 %v961_v60, %v896_v30  ;;  %v554_v41 = vadd.f32 %v2606_v62, %v553_v39  ;;  %v602_v42 = vadd.f32 %v2606_v62, %v601_v63  ;;  %1077 = vst [vmem:[%s2059_s6 + $0x2f0] sm:$0xff] %v460_v19  ;;  %v1555_v39 = vld [vmem:[%s1891_s12 + $0x3d0] sm:$0xff]  ;;  %v820_v36 = vmul.f32 %v2137_v53, %v2690_v0 }
 0x158   : > { %v1504_v31 = vpop.eup %1503  ;;  %1137 = vst [vmem:[%s2059_s6 + $0x2b8] sm:$0xff] %v1009_v8  ;;  %v849_v11 = vsub.f32 %v1502_v47, %v785_v18  ;;  %v818_v18 = vmul.f32 %v2137_v53, %v2595_v5  ;;  %v963_v5 = vmul.f32 %v1555_v39, %v2144_v61 }
 0x159   : > { %1153 = vst [vmem:[%s2059_s6 + $0x3b8] sm:$0xff] %v1025_v56  ;;  %v865_v28 = vsub.f32 %v1504_v31, %v801_v46  ;;  %1509 = vtanh.f32 %v554_v41  ;;  %v787_v41 = vmul.f32 %v2137_v53, %v2622_v16  ;;  %v1556_v31 = vld [vmem:[%s1891_s12 + $0xe0] sm:$0xff] }
 0x15a   : > { %v978_v4 = vadd.f32 %v914_v45, %v849_v11  ;;  %1511 = vtanh.f32 %v602_v42  ;;  %v649_v9 = vpop.f32.mrf.mxu2  ;;  %v697_v22 = vpop.f32.mrf.mxu3  ;;  %1093 = vst [vmem:[%s2059_s6 + $0x3f0] sm:$0xff] %v476_v26  ;;  %v1554_v45 = vld [vmem:[%s1891_s12 + $0x2d0] sm:$0xff]  ;;  %v803_v26 = vmul.f32 %v2137_v53, %v2634_v32  ;;  %v916_v11 = vmul.f32 %v1556_v31, %v2144_v61 }
 0x15b   : > { %v1506_v38 = vpop.eup %1505  ;;  %v994_v20 = vadd.f32 %v930_v51, %v865_v28  ;;  %v650_v10 = vadd.f32 %v2606_v62, %v649_v9  ;;  %v698_v14 = vadd.f32 %v2606_v62, %v697_v22  ;;  %v947_v30 = vmul.f32 %v1554_v45, %v2144_v61  ;;  %v1562_v45 = vld [vmem:[%s1891_s12 + $0x2f0] sm:$0xff] }
 0x15c   : > { %v1508_v49 = vpop.eup %1507  ;;  %1106 = vst [vmem:[%s2059_s6 + $0xc8] sm:$0xff] %v978_v4  ;;  %v881_v1 = vsub.f32 %v1506_v38, %v817_v54 }
 0x15d   : > { %1122 = vst [vmem:[%s2059_s6 + $0x1c8] sm:$0xff] %v994_v20  ;;  %v897_v58 = vsub.f32 %v1508_v49, %v833_v57  ;;  %1513 = vtanh.f32 %v650_v10  ;;  %v835_v20 = vmul.f32 %v2137_v53, %v2656_v48  ;;  %v1558_v10 = vld [vmem:[%s1891_s12 + $0x2e0] sm:$0xff] }
 0x15e   : > { %v1010_v3 = vadd.f32 %v946_v44, %v881_v1  ;;  %1515 = vtanh.f32 %v698_v14  ;;  %v556_v25 = vpop.f32.mrf.mxu0  ;;  %v604_v27 = vpop.f32.mrf.mxu1  ;;  %v1557_v44 = vld [vmem:[%s1891_s12 + $0x1e0] sm:$0xff]  ;;  %v948_v14 = vmul.f32 %v1558_v10, %v2144_v61 }
 0x15f   : > { %v1510_v60 = vpop.eup %1509  ;;  %v1026_v52 = vadd.f32 %v962_v37, %v897_v58  ;;  %v557_v6 = vadd.f32 %v2606_v62, %v556_v25  ;;  %v605_v43 = vadd.f32 %v2606_v62, %v604_v27  ;;  %v932_v16 = vmul.f32 %v1557_v44, %v2144_v61 }
 0x160   : > { %v1512_v7 = vpop.eup %1511  ;;  %1138 = vst [vmem:[%s2059_s6 + $0x2c8] sm:$0xff] %v1010_v3  ;;  %v850_v55 = vsub.f32 %v1510_v60, %v786_v40  ;;  %v788_v27 = vmul.f32 %v2137_v53, %v2666_v21 }
 0x161   : > { %1154 = vst [vmem:[%s2059_s6 + $0x3c8] sm:$0xff] %v1026_v52  ;;  %v866_v15 = vsub.f32 %v1512_v7, %v802_v24  ;;  %1517 = vtanh.f32 %v557_v6  ;;  %v1559_v24 = vld [vmem:[%s1891_s12 + $0x3e0] sm:$0xff] }
 0x162   : > { %v979_v46 = vadd.f32 %v915_v50, %v850_v55  ;;  %1519 = vtanh.f32 %v605_v43  ;;  %v652_v2 = vpop.f32.mrf.mxu2  ;;  %v700_v51 = vpop.f32.mrf.mxu3  ;;  %v964_v35 = vmul.f32 %v1559_v24, %v2144_v61  ;;  %v1561_v43 = vld [vmem:[%s1891_s12 + $0x1f0] sm:$0xff] }
 0x163   : > { %v1514_v8 = vpop.eup %1513  ;;  %v995_v63 = vadd.f32 %v931_v59, %v866_v15  ;;  %v653_v19 = vadd.f32 %v2606_v62, %v652_v2  ;;  %v701_v47 = vadd.f32 %v2606_v62, %v700_v51  ;;  %v1560_v59 = vld [vmem:[%s1891_s12 + $0xf0] sm:$0xff]  ;;  %v933_v7 = vmul.f32 %v1561_v43, %v2144_v61 }
 0x164   : > { %v1516_v34 = vpop.eup %1515  ;;  %1107 = vst [vmem:[%s2059_s6 + $0xd8] sm:$0xff] %v979_v46  ;;  %v882_v56 = vsub.f32 %v1514_v8, %v818_v18  ;;  %v917_v52 = vmul.f32 %v1560_v59, %v2144_v61  ;;  %v1563_v51 = vld [vmem:[%s1891_s12 + $0x3f0] sm:$0xff] }
 0x165   : > { %1123 = vst [vmem:[%s2059_s6 + $0x1d8] sm:$0xff] %v995_v63  ;;  %v898_v42 = vsub.f32 %v1516_v34, %v834_v13  ;;  %1521 = vtanh.f32 %v653_v19  ;;  %v836_v13 = vmul.f32 %v2137_v53, %v2697_v17  ;;  %v965_v8 = vmul.f32 %v1563_v51, %v2144_v61 }
 0x166   : > { %v1011_v54 = vadd.f32 %v947_v30, %v882_v56  ;;  %1523 = vtanh.f32 %v701_v47  ;;  %v559_v28 = vpop.f32.mrf.mxu0  ;;  %v607_v57 = vpop.f32.mrf.mxu1  ;;  %v949_v30 = vmul.f32 %v1562_v45, %v2144_v61 }
 0x167   : > { %v1518_v12 = vpop.eup %1517  ;;  %v1027_v4 = vadd.f32 %v963_v5, %v898_v42  ;;  %v560_v9 = vadd.f32 %v2606_v62, %v559_v28  ;;  %v608_v22 = vadd.f32 %v2606_v62, %v607_v57 }
 0x168   : > { %v1520_v32 = vpop.eup %1519  ;;  %1139 = vst [vmem:[%s2059_s6 + $0x2d8] sm:$0xff] %v1011_v54  ;;  %v851_v38 = vsub.f32 %v1518_v12, %v787_v41 }
 0x169   : > { %1155 = vst [vmem:[%s2059_s6 + $0x3d8] sm:$0xff] %v1027_v4  ;;  %v867_v37 = vsub.f32 %v1520_v32, %v803_v26  ;;  %1525 = vtanh.f32 %v560_v9 }
 0x16a   : > { %v980_v49 = vadd.f32 %v916_v11, %v851_v38  ;;  %1527 = vtanh.f32 %v608_v22  ;;  %v655_v1 = vpop.f32.mrf.mxu2  ;;  %v703_v40 = vpop.f32.mrf.mxu3 }
 0x16b   : > { %v1522_v58 = vpop.eup %1521  ;;  %v996_v23 = vadd.f32 %v932_v16, %v867_v37  ;;  %v656_v50 = vadd.f32 %v2606_v62, %v655_v1  ;;  %v704_v48 = vadd.f32 %v2606_v62, %v703_v40 }
 0x16c   : > { %v1524_v3 = vpop.eup %1523  ;;  %1108 = vst [vmem:[%s2059_s6 + $0xe8] sm:$0xff] %v980_v49  ;;  %v883_v25 = vsub.f32 %v1522_v58, %v819_v33 }
 0x16d   : > { %1124 = vst [vmem:[%s2059_s6 + $0x1e8] sm:$0xff] %v996_v23  ;;  %v899_v60 = vsub.f32 %v1524_v3, %v835_v20  ;;  %1529 = vtanh.f32 %v656_v50 }
 0x16e   : > { %v1012_v6 = vadd.f32 %v948_v14, %v883_v25  ;;  %1531 = vtanh.f32 %v704_v48 }
 0x16f   : > { %v1526_v62 = vpop.eup %1525  ;;  %v1028_v55 = vadd.f32 %v964_v35, %v899_v60 }
 0x170   : > { %v1528_v21 = vpop.eup %1527  ;;  %1140 = vst [vmem:[%s2059_s6 + $0x2e8] sm:$0xff] %v1012_v6  ;;  %v852_v18 = vsub.f32 %v1526_v62, %v788_v27 }
 0x171   : > { %1156 = vst [vmem:[%s2059_s6 + $0x3e8] sm:$0xff] %v1028_v55  ;;  %v868_v15 = vsub.f32 %v1528_v21, %v804_v29 }
 0x172   : > { %v981_v46 = vadd.f32 %v917_v52, %v852_v18 }
 0x173   : > { %v1530_v2 = vpop.eup %1529  ;;  %v997_v39 = vadd.f32 %v933_v7, %v868_v15 }
 0x174   : > { %v1532_v5 = vpop.eup %1531  ;;  %1109 = vst [vmem:[%s2059_s6 + $0xf8] sm:$0xff] %v981_v46  ;;  %v884_v0 = vsub.f32 %v1530_v2, %v820_v36 }
 0x175   : > { %1125 = vst [vmem:[%s2059_s6 + $0x1f8] sm:$0xff] %v997_v39  ;;  %v900_v63 = vsub.f32 %v1532_v5, %v836_v13  ;;  %1165 = sbr.rel (!%p1813_p11) target bundleno = 409 (0x199), region = 52 }
 0x176   : > { %v1013_v19 = vadd.f32 %v949_v30, %v884_v0 }
 0x177   : > { %v1029_v47 = vadd.f32 %v965_v8, %v900_v63 }
 0x178   : > { %1141 = vst [vmem:[%s2059_s6 + $0x2f8] sm:$0xff] %v1013_v19 }
 0x179   : > { %1157 = vst [vmem:[%s2059_s6 + $0x3f8] sm:$0xff] %v1029_v47 }
 0x17a   : > { %s2887_s14 = smov (!%p1168_p6, %s1167_s14), 64 }
 0x17b   : > { %s1297_s1 = sshll.u32 %s2887_s14, 4 }
 0x17c   : > { %s1172_s27 = ssub.s32 1024, %s1297_s1 }
 0x17d   : > { %s1173_s18 = sshll.u32 %s1172_s27, 4 }
 0x17e   : > { %1174 = vsyncadd %s1159_s17, %s1173_s18  ;;  %p2798_p13 = scmp.ne.s32.totalorder %s1297_s1, 0  ;;  %s1299_s21 = sshll.u32 %s1782_s0, 10 }
 0x17f   : > { %s1178_s12 = scalar_lea.hbm %s2857_s5, %s1299_s21  ;;  %s1180_s9 = sshll.u32 %s2059_s6, 4  ;;  %s2807_s9 = int_to_ptr.vmem [resolvable:$true] %s1180_s9 }
 0x180   : > { %s1182_s20 = sshll.u32 %s1178_s12, 4  ;;  %s1291_s28 = sshll.u32 %s2887_s14, 8  ;;  %s2809_s20 = int_to_ptr.hbm [resolvable:$true] %s1182_s20 }
 0x181   : > { %s1633_s30 = sshra.s32 %s2807_s9, 4  ;;  %s1635_s15 = sshrl.u32 %s1291_s28, 4  ;;  %s1634_s30 = int_to_ptr.vmem [resolvable:$true] %s1633_s30 }
 0x182   : > { %s1640_s16 = scalar_lea.vmem %s1634_s30, %s1635_s15  ;;  %s1722_s0 = smov [#allocation9]  }
 0x183   : > { %p1641_p11 = scmp.ne.s32.totalorder %s1634_s30, %s1640_s16  ;;  %s1644_s13 = scalar_lea.vmem %s1722_s0, 2048 }
 0x184   : > { %p1646_p9 = scmp.lt.s32.totalorder %s1644_s13, %s1640_s16 }
 0x185   : > { %p1642_p2 = pnand %p1641_p11, %p2798_p13 }
 0x187   : > { %p1643_p5 = pneg %p1642_p2 }
 0x189   : > { %p1648_p10 = pnand %p1646_p9, %p1643_p5 }
 0x18b   : > { %1651 = shalt.err (!%p1648_p10)
}
 0x18c   : > { %s1652_s6 = sshra.s32 %s2809_s20, 4  ;;  %s1663_s21 = scalar_lea.hbm %s2857_s5, 2000  ;;  %s1653_s6 = int_to_ptr.hbm [resolvable:$true] %s1652_s6 }
 0x18d   : > { %s1659_s1 = scalar_lea.hbm %s1653_s6, %s1635_s15  ;;  %p1664_p7 = scmp.lt.s32.totalorder %s1653_s6, %s2857_s5 }
 0x18e   : > { %p1660_p1 = scmp.ne.s32.totalorder %s1653_s6, %s1659_s1  ;;  %p1665_p8 = scmp.lt.s32.totalorder %s1663_s21, %s1659_s1 }
 0x190   : > { %p1661_p0 = pnand %p1660_p1, %p2798_p13  ;;  %p1666_p4 = por %p1665_p8, %p1664_p7 }
 0x192   : > { %p1662_p3 = pneg %p1661_p0 }
 0x194   : > { %p1667_p12 = pnand %p1666_p4, %p1662_p3 }
 0x196   : > { %1670 = shalt.err (!%p1667_p12)
}
 0x197   : > { %s1723_s12 = smov 256   ;;  %s1724_s30 = smov 16  }
 0x198   : > { %1188 = dma.vmem_to_hbm [thread:$0]  (%p2798_p13), %s2807_s9, %s1291_s28, %s2809_s20, %s1159_s17, %s1723_s12, %s1723_s12, %s1724_s30  }
 0x199 PF: > { %s1197_s15 = sand.u32 1, %s1702_s22   ;;  %p2878_p6 = scmp.ne.s32.totalorder %s2866_s8, 0 }
 0x19a   : > { %p2879_p11 = scmp.ge.s32.totalorder %s1714_s25, 2  ;;  %s1198_s16 = scalar_lea.sflag [#allocation6], %s1197_s15 }
 0x19c   : > { %p1359_p2 = pnand %p2879_p11, %p2878_p6 }
 0x19e   : > { %p1360_p5 = pneg %p1359_p2 }
 0x1a0   : > { %1697 = dma.done.wait (%p1360_p5), %s1198_s16, 16384  }
 0x1a1   : > { %1699 = vsyncadd (%p1360_p5), %s1198_s16, 4294950912  ;;  %p21_p9 = scmp.ge.s32.totalorder %s1786_s26, 4   ;;  %s2880_s22 = smov %s1706_s23 }
 0x1a2   : > { %s2881_s23 = smov %s1710_s24  ;;  %s2882_s24 = smov %s1798_s29 }
 0x1a3   : > { %s2883_s25 = smov %s1786_s26  ;;  %23 = sbr.rel (!%p21_p9) target bundleno = 9 (0x9), region = 89 }
 0x1a8   :  { %1204 = vsyncpa [#allocation5], 1 }
 0x1a9   :  { %1206 = vsyncpa [#allocation5 + $0x1], 1 }
 0x1aa   :  { %1207 = vsyncpa [#allocation8], 1 }
 0x1ab   :  { %1208 = vsyncpa [#allocation6], 1 }
 0x1ac   :  { %1210 = vsyncpa [#allocation6 + $0x1], 1 }

</bundles_post_ra>
